<compile_context>
chip_gen: v7x
topology: tpu7x:2x2x1
jax: 0.10.0
libtpu: 0.0.40
codegen_flags: <defaults>
</compile_context>

<pallas_src>
import functools

import jax
import jax.numpy as jnp
from jax.experimental import pallas as pl
from jax.experimental.pallas import tpu as pltpu


# ----------------------------------------------------------------------------
# Fused Pallas kernel: whole decoder for one batch tile.
# ----------------------------------------------------------------------------
def _fused_decoder_kernel(x_ref, *refs, n_layers):
    """refs = (w0, b0, w1, b1, ..., o_ref), weights in EXECUTION order.

    x_ref : (TM, bottleneck)    f32 batch tile (unpadded columns)
    w_i   : (in_p, out_p)       bf16, pre-transposed, zero-padded weight
    b_i   : (1, out_p)          f32, zero-padded bias
    o_ref : (TM, out_last_p)    f32, lane-dense (multiple-of-128) output
    """
    o_ref = refs[-1]
    wb = refs[:-1]

    h = x_ref[...]                                    # f32 (TM, bottleneck)
    in0_p = wb[0].shape[0]
    if h.shape[1] < in0_p:                            # static; no-op for bottleneck=32
        h = jnp.pad(h, ((0, 0), (0, in0_p - h.shape[1])))

    for li in range(n_layers):
        w = wb[2 * li][...]                           # bf16 (in_p, out_p)
        b = wb[2 * li + 1][...]                       # f32  (1, out_p)
        # bf16 operands on the MXU, f32 accumulation; bias/epilogue in f32.
        y = jnp.dot(h.astype(jnp.bfloat16), w,
                    preferred_element_type=jnp.float32) + b
        if li < n_layers - 1:
            h = jnp.maximum(y, 0.0)                   # ReLU on the VPU
        else:
            # Exact sigmoid via one EUP tanh push; bounded in [0, 1].
            h = 0.5 * jnp.tanh(0.5 * y) + 0.5
    o_ref[...] = h.astype(o_ref.dtype)


def _fused_decoder_call(x_p, flat_wb, tm):
    """x_p: (B_pad, bottleneck); flat_wb: [w0, b0, w1, b1, ...] prepared."""
    b_pad, in0 = x_p.shape
    n_layers = len(flat_wb) // 2
    out_p = flat_wb[-1].shape[1]

    x_spec = pl.BlockSpec((tm, in0), lambda i: (i, 0))
    # Constant index_map -> weights/biases are DMA'd once and stay resident.
    wb_specs = [pl.BlockSpec(a.shape, lambda i: (0, 0)) for a in flat_wb]
    out_spec = pl.BlockSpec((tm, out_p), lambda i: (i, 0))

    return pl.pallas_call(
        functools.partial(_fused_decoder_kernel, n_layers=n_layers),
        out_shape=jax.ShapeDtypeStruct((b_pad, out_p), jnp.float32),
        grid=(b_pad // tm,),
        in_specs=[x_spec] + wb_specs,
        out_specs=out_spec,
        compiler_params=pltpu.CompilerParams(
            dimension_semantics=("parallel",)),
    )(x_p, *flat_wb)


# ----------------------------------------------------------------------------
# Parameters: PyTorch-style init, then one-time transpose + pad + bf16 cast.
# ----------------------------------------------------------------------------
def init_decoder_params(key, layercount, bottleneck):
    """Replicates the layer shapes of the PyTorch Decoder.__init__.

    layers[i]            : Linear(784 // (i + 2) -> 784 // (i + 1))  for i < layercount-1
    layers[layercount-1] : Linear(bottleneck     -> 784 // layercount)
    Weights stored PyTorch-style as (out_features, in_features), f32.
    """
    shapes = []
    for i in range(layercount - 1):
        shapes.append((int(28 * 28 // (i + 2)), int(28 * 28 // (i + 1))))  # (in, out)
    shapes.append((bottleneck, int(28 * 28 // layercount)))

    params = []
    for (in_f, out_f) in shapes:
        key, kw, kb = jax.random.split(key, 3)
        bound = 1.0 / float(in_f) ** 0.5
        w = jax.random.uniform(kw, (out_f, in_f), jnp.float32, -bound, bound)
        b = jax.random.uniform(kb, (out_f,), jnp.float32, -bound, bound)
        params.append((w, b))
    return params


def _round_up(n, m):
    return ((n + m - 1) // m) * m


def prepare_decoder_params(params):
    """One-time prep: reorder to execution order (last layer first), transpose
    weights to (in, out), zero-pad output dims to multiples of 128 (first
    layer's input dim only to a multiple of 8), cast weights to bf16.

    Returns flat list [w0_p, b0_p, w1_p, b1_p, ...] (execution order).
    """
    exec_order = params[::-1]  # forward applies layers[-1], ..., layers[1], layers[0]
    flat = []
    for li, (w, b) in enumerate(exec_order):
        out_f, in_f = w.shape
        # Inner layers' input pad must match the previous layer's output pad (128);
        # the first (bottleneck) input only needs sublane (8) alignment.
        in_p = _round_up(in_f, 8) if li == 0 else _round_up(in_f, 128)
        out_p = _round_up(out_f, 128)
        w_t = jnp.transpose(w)  # (in_f, out_f)
        w_p = jnp.pad(w_t, ((0, in_p - in_f), (0, out_p - out_f))).astype(jnp.bfloat16)
        b_p = jnp.pad(b.reshape(1, -1), ((0, 0), (0, out_p - out_f))).astype(jnp.float32)
        flat.append(w_p)
        flat.append(b_p)
    return flat


# ----------------------------------------------------------------------------
# Forward pass (jitted). Matches Decoder.forward.
# ----------------------------------------------------------------------------
@jax.jit
def decoder_forward(flat_wb, x):
    """x: (B, bottleneck) -> (B, 1, 28, 28)."""
    B = x.shape[0]
    # Batch tile: multiple of 8 sublanes; 256 matches the v6e/v7x MXU for big B.
    tm = min(256, _round_up(B, 8))
    b_pad = _round_up(B, tm)
    x_p = jnp.pad(x, ((0, b_pad - B), (0, 0)))        # pad batch rows only (inert)
    y_p = _fused_decoder_call(x_p, flat_wb, tm)       # (B_pad, 896) lane-dense
    y = y_p[:B, : 28 * 28]                            # drop pad rows / zero cols
    return y.reshape(B, 1, 28, 28)                    # nn.Unflatten (pure reshape)


def decoder_forward_ref(params, x):
    """Pure-JAX f32 reference of the PyTorch forward, for correctness checks."""
    n = len(params)
    for i in range(n - 1):
        w, b = params[n - 1 - i]
        x = jnp.maximum(x @ w.T + b, 0.0)
    w, b = params[0]
    x = jax.nn.sigmoid(x @ w.T + b)
    return x.reshape(x.shape[0], 1, 28, 28)


# ----------------------------------------------------------------------------
if __name__ == "__main__":
    layercount = 3      # layers (exec order): 32->261, 261->392, 392->784
    bottleneck = 32
    batch = 2

    key = jax.random.PRNGKey(0)
    key_params, key_x = jax.random.split(key)

    params = init_decoder_params(key_params, layercount, bottleneck)
    flat_wb = prepare_decoder_params(params)   # one-time transpose + pad + bf16
    x = jax.random.normal(key_x, (batch, bottleneck), jnp.float32)

    out = decoder_forward(flat_wb, x)
    out = jax.block_until_ready(out)

    assert out.shape == (batch, 1, 28, 28), out.shape
    assert out.dtype == jnp.float32
    # Exact tanh-form sigmoid is bounded in [0, 1].
    assert bool(jnp.all((out >= 0.0) & (out <= 1.0)))

    # Check against the pure-f32 reference; tolerance accounts for bf16 weights
    # / bf16 matmul operands (f32 accumulation keeps the error small, and the
    # sigmoid compresses it further).
    ref = decoder_forward_ref(params, x)
    max_err = float(jnp.max(jnp.abs(out - ref)))
    assert max_err < 2e-2, f"max abs err = {max_err}"

    print("KERNEL_OK")
</pallas_src>

<mosaic_0001>
module attributes {stable_mosaic.version = 11 : i64} {
  func.func @_fused_decoder_kernel(%arg0: i32, %arg1: memref<8x32xf32, #tpu.memory_space<vmem>>, %arg2: memref<32x384xbf16, #tpu.memory_space<vmem>>, %arg3: memref<1x384xf32, #tpu.memory_space<vmem>>, %arg4: memref<384x512xbf16, #tpu.memory_space<vmem>>, %arg5: memref<1x512xf32, #tpu.memory_space<vmem>>, %arg6: memref<512x896xbf16, #tpu.memory_space<vmem>>, %arg7: memref<1x896xf32, #tpu.memory_space<vmem>>, %arg8: memref<8x896xf32, #tpu.memory_space<vmem>>) attributes {dimension_semantics = [#tpu.dimension_semantics<parallel>], iteration_bounds = array<i64: 1>, scalar_prefetch = 0 : i64, scratch_operands = 0 : i64, tpu.core_type = #tpu.core_type<tc>, window_params = [{transform_indices = @transform_0, window_bounds = array<i64: 8, 32>}, {pipeline_mode = #tpu.pipeline_mode<synchronous>, transform_indices = @transform_1, window_bounds = array<i64: 32, 384>}, {pipeline_mode = #tpu.pipeline_mode<synchronous>, transform_indices = @transform_2, window_bounds = array<i64: 1, 384>}, {pipeline_mode = #tpu.pipeline_mode<synchronous>, transform_indices = @transform_3, window_bounds = array<i64: 384, 512>}, {pipeline_mode = #tpu.pipeline_mode<synchronous>, transform_indices = @transform_4, window_bounds = array<i64: 1, 512>}, {pipeline_mode = #tpu.pipeline_mode<synchronous>, transform_indices = @transform_5, window_bounds = array<i64: 512, 896>}, {pipeline_mode = #tpu.pipeline_mode<synchronous>, transform_indices = @transform_6, window_bounds = array<i64: 1, 896>}, {transform_indices = @transform_7, window_bounds = array<i64: 8, 896>}]} {
    %c0 = arith.constant 0 : index
    %c0_0 = arith.constant 0 : index
    %0 = vector.load %arg1[%c0, %c0_0] : memref<8x32xf32, #tpu.memory_space<vmem>>, vector<8x32xf32>
    %c0_1 = arith.constant 0 : index
    %c0_2 = arith.constant 0 : index
    %1 = vector.load %arg2[%c0_1, %c0_2] : memref<32x384xbf16, #tpu.memory_space<vmem>>, vector<32x384xbf16>
    %c0_3 = arith.constant 0 : index
    %c0_4 = arith.constant 0 : index
    %2 = vector.load %arg3[%c0_3, %c0_4] : memref<1x384xf32, #tpu.memory_space<vmem>>, vector<1x384xf32>
    %3 = arith.truncf %0 : vector<8x32xf32> to vector<8x32xbf16>
    %cst = arith.constant dense<0.000000e+00> : vector<8x384xf32>
    %4 = tpu.matmul %3, %1, %cst {dimension_numbers = #tpu.dot_dimension_numbers<[1], [0], [0], [1], [0, 0, 1, 1], [], []>} : vector<8x32xbf16>, vector<32x384xbf16>, vector<8x384xf32> -> vector<8x384xf32>
    %5 = vector.broadcast %2 : vector<1x384xf32> to vector<8x384xf32>
    %6 = arith.addf %4, %5 : vector<8x384xf32>
    %cst_5 = arith.constant 0.000000e+00 : f32
    %7 = vector.broadcast %cst_5 : f32 to vector<8x384xf32>
    %8 = arith.maximumf %6, %7 : vector<8x384xf32>
    %c0_6 = arith.constant 0 : index
    %c0_7 = arith.constant 0 : index
    %9 = vector.load %arg4[%c0_6, %c0_7] : memref<384x512xbf16, #tpu.memory_space<vmem>>, vector<384x512xbf16>
    %c0_8 = arith.constant 0 : index
    %c0_9 = arith.constant 0 : index
    %10 = vector.load %arg5[%c0_8, %c0_9] : memref<1x512xf32, #tpu.memory_space<vmem>>, vector<1x512xf32>
    %11 = arith.truncf %8 : vector<8x384xf32> to vector<8x384xbf16>
    %cst_10 = arith.constant dense<0.000000e+00> : vector<8x512xf32>
    %12 = tpu.matmul %11, %9, %cst_10 {dimension_numbers = #tpu.dot_dimension_numbers<[1], [0], [0], [1], [0, 0, 1, 1], [], []>} : vector<8x384xbf16>, vector<384x512xbf16>, vector<8x512xf32> -> vector<8x512xf32>
    %13 = vector.broadcast %10 : vector<1x512xf32> to vector<8x512xf32>
    %14 = arith.addf %12, %13 : vector<8x512xf32>
    %cst_11 = arith.constant 0.000000e+00 : f32
    %15 = vector.broadcast %cst_11 : f32 to vector<8x512xf32>
    %16 = arith.maximumf %14, %15 : vector<8x512xf32>
    %c0_12 = arith.constant 0 : index
    %c0_13 = arith.constant 0 : index
    %17 = vector.load %arg6[%c0_12, %c0_13] : memref<512x896xbf16, #tpu.memory_space<vmem>>, vector<512x896xbf16>
    %c0_14 = arith.constant 0 : index
    %c0_15 = arith.constant 0 : index
    %18 = vector.load %arg7[%c0_14, %c0_15] : memref<1x896xf32, #tpu.memory_space<vmem>>, vector<1x896xf32>
    %19 = arith.truncf %16 : vector<8x512xf32> to vector<8x512xbf16>
    %cst_16 = arith.constant dense<0.000000e+00> : vector<8x896xf32>
    %20 = tpu.matmul %19, %17, %cst_16 {dimension_numbers = #tpu.dot_dimension_numbers<[1], [0], [0], [1], [0, 0, 1, 1], [], []>} : vector<8x512xbf16>, vector<512x896xbf16>, vector<8x896xf32> -> vector<8x896xf32>
    %21 = vector.broadcast %18 : vector<1x896xf32> to vector<8x896xf32>
    %22 = arith.addf %20, %21 : vector<8x896xf32>
    %cst_17 = arith.constant 5.000000e-01 : f32
    %23 = vector.broadcast %cst_17 : f32 to vector<8x896xf32>
    %24 = arith.mulf %23, %22 : vector<8x896xf32>
    %25 = math.tanh %24 : vector<8x896xf32>
    %cst_18 = arith.constant 5.000000e-01 : f32
    %26 = vector.broadcast %cst_18 : f32 to vector<8x896xf32>
    %27 = arith.mulf %26, %25 : vector<8x896xf32>
    %cst_19 = arith.constant 5.000000e-01 : f32
    %28 = vector.broadcast %cst_19 : f32 to vector<8x896xf32>
    %29 = arith.addf %27, %28 : vector<8x896xf32>
    %c0_20 = arith.constant 0 : index
    %c0_21 = arith.constant 0 : index
    %30 = vector.load %arg8[%c0_20, %c0_21] : memref<8x896xf32, #tpu.memory_space<vmem>>, vector<8x896xf32>
    tpu.vector_store %arg8[%c0_20, %c0_21], %29 {strides = array<i32>} : memref<8x896xf32, #tpu.memory_space<vmem>>, vector<8x896xf32>,
    return
  }
  func.func @transform_0(%arg0: i32) -> (i32, i32) {
    %c0_i32 = arith.constant 0 : i32
    %c0_i32_0 = arith.constant 0 : i32
    return %arg0, %c0_i32 : i32, i32
  }
  func.func @transform_1(%arg0: i32) -> (i32, i32) {
    %c0_i32 = arith.constant 0 : i32
    %c0_i32_0 = arith.constant 0 : i32
    %c0_i32_1 = arith.constant 0 : i32
    return %c0_i32, %c0_i32_0 : i32, i32
  }
  func.func @transform_2(%arg0: i32) -> (i32, i32) {
    %c0_i32 = arith.constant 0 : i32
    %c0_i32_0 = arith.constant 0 : i32
    %c0_i32_1 = arith.constant 0 : i32
    return %c0_i32, %c0_i32_0 : i32, i32
  }
  func.func @transform_3(%arg0: i32) -> (i32, i32) {
    %c0_i32 = arith.constant 0 : i32
    %c0_i32_0 = arith.constant 0 : i32
    %c0_i32_1 = arith.constant 0 : i32
    return %c0_i32, %c0_i32_0 : i32, i32
  }
  func.func @transform_4(%arg0: i32) -> (i32, i32) {
    %c0_i32 = arith.constant 0 : i32
    %c0_i32_0 = arith.constant 0 : i32
    %c0_i32_1 = arith.constant 0 : i32
    return %c0_i32, %c0_i32_0 : i32, i32
  }
  func.func @transform_5(%arg0: i32) -> (i32, i32) {
    %c0_i32 = arith.constant 0 : i32
    %c0_i32_0 = arith.constant 0 : i32
    %c0_i32_1 = arith.constant 0 : i32
    return %c0_i32, %c0_i32_0 : i32, i32
  }
  func.func @transform_6(%arg0: i32) -> (i32, i32) {
    %c0_i32 = arith.constant 0 : i32
    %c0_i32_0 = arith.constant 0 : i32
    %c0_i32_1 = arith.constant 0 : i32
    return %c0_i32, %c0_i32_0 : i32, i32
  }
  func.func @transform_7(%arg0: i32) -> (i32, i32) {
    %c0_i32 = arith.constant 0 : i32
    %c0_i32_0 = arith.constant 0 : i32
    return %arg0, %c0_i32 : i32, i32
  }
}

</mosaic_0001>

<bundles_post_ra>
// kernel: decoder_forward.1
= control target key start
LH: loop header
LB: loop body
LE: loop exit
PB: predicated region body
PF: predicated region fallthrough
CT: control target
= control target key end

     0   :  { %12 = vsyncpa [#allocation3], 0  ;;  %s3978_s0 = inlined_call_operand.vmem [shape: f32[8,32], index: 0, kind: input, shape index: {}]   ;;  %s3979_s1 = inlined_call_operand.hbm [shape: bf16[32,384], index: 1, kind: input, shape index: {}]   ;;  %s3980_s2 = inlined_call_operand.vmem [shape: f32[1,384], index: 2, kind: input, shape index: {}]   ;;  %s3981_s3 = inlined_call_operand.hbm [shape: bf16[384,512], index: 3, kind: input, shape index: {}]   ;;  %s3982_s4 = inlined_call_operand.vmem [shape: f32[1,512], index: 4, kind: input, shape index: {}]   ;;  %s3983_s5 = inlined_call_operand.hbm [shape: bf16[512,896], index: 5, kind: input, shape index: {}]   ;;  %s3984_s6 = inlined_call_operand.vmem [shape: f32[1,896], index: 6, kind: input, shape index: {}]   ;;  %s3985_s7 = inlined_call_operand.vmem [shape: f32[8,896], index: 7, kind: output, shape index: {}]  }
   0x1   :  { %13 = vsyncpa [#allocation5], 0  ;;  %s3779_s24 = smov [#allocation4]   ;;  %s3709_s28 = scalar_lea.hbm %s3981_s3, 12288 }
   0x2   :  { %s35_s25 = sshll.u32 %s3779_s24, 4  ;;  %p3710_p0 = scmp.ne.s32.totalorder %s3981_s3, %s3709_s28  ;;  %s36_s25 = int_to_ptr.vmem [resolvable:$true] %s35_s25 }
   0x3   :  { %p3713_p1 = scmp.lt.u32.totalorder %s3709_s28, %s3981_s3 }
   0x5   :  { %p3715_p2 = pnand %p3713_p1, %p3710_p0 }
   0x7   :  { %3718 = shalt.err (!%p3715_p2)
}
   0x8   :  { %s3719_s10 = scalar_lea.vmem %s36_s25, 12288  ;;  %p3724_p4 = scmp.lt.s32.totalorder %s36_s25, %s36_s25 }
   0x9   :  { %p3720_p3 = scmp.ne.s32.totalorder %s36_s25, %s3719_s10  ;;  %p3725_p5 = scmp.lt.s32.totalorder %s3719_s10, %s3719_s10 }
   0xb   :  { %p3726_p6 = por %p3725_p5, %p3724_p4 }
   0xd   :  { %p3727_p7 = pnand %p3726_p6, %p3720_p3 }
   0xf   :  { %3730 = shalt.err (!%p3727_p7)
}
  0x10   :  { %s3780_s11 = smov 256   ;;  %s3781_s12 = smov 16  }
  0x11   :  { %41 = dma.hbm_to_vmem [thread:$0]  %s3981_s3, 12288, %s36_s25, [#allocation5], %s3780_s11, %s3780_s11, %s3781_s12  }
  0x12   :  { %s3782_s15 = smov [#allocation2]   ;;  %s3731_s19 = scalar_lea.hbm %s3979_s1, 768 }
  0x13   :  { %s21_s16 = sshll.u32 %s3782_s15, 4  ;;  %p3732_p8 = scmp.ne.s32.totalorder %s3979_s1, %s3731_s19  ;;  %s22_s16 = int_to_ptr.vmem [resolvable:$true] %s21_s16 }
  0x14   :  { %p3735_p9 = scmp.lt.u32.totalorder %s3731_s19, %s3979_s1 }
  0x16   :  { %p3737_p10 = pnand %p3735_p9, %p3732_p8 }
  0x18   :  { %3740 = shalt.err (!%p3737_p10)
}
  0x19   :  { %s3741_s24 = scalar_lea.vmem %s22_s16, 768  ;;  %p3746_p12 = scmp.lt.s32.totalorder %s22_s16, %s22_s16 }
  0x1a   :  { %p3742_p11 = scmp.ne.s32.totalorder %s22_s16, %s3741_s24  ;;  %p3747_p13 = scmp.lt.s32.totalorder %s3741_s24, %s3741_s24 }
  0x1c   :  { %p3748_p0 = por %p3747_p13, %p3746_p12 }
  0x1e   :  { %p3749_p1 = pnand %p3748_p0, %p3742_p11 }
  0x20   :  { %3752 = shalt.err (!%p3749_p1)
}
  0x21   :  { %s3783_s3 = smov 192   ;;  %s3784_s25 = smov 12  }
  0x22   :  { %27 = dma.hbm_to_vmem [thread:$0]  %s3979_s1, 768, %s22_s16, [#allocation3], %s3783_s3, %s3783_s3, %s3784_s25  }
  0x23   :  { %s3785_s28 = smov [#allocation6]   ;;  %s3753_s9 = scalar_lea.hbm %s3983_s5, 28672 }
  0x24   :  { %s49_s29 = sshll.u32 %s3785_s28, 4  ;;  %p3754_p2 = scmp.ne.s32.totalorder %s3983_s5, %s3753_s9  ;;  %s50_s29 = int_to_ptr.vmem [resolvable:$true] %s49_s29 }
  0x25   :  { %p3757_p3 = scmp.lt.u32.totalorder %s3753_s9, %s3983_s5 }
  0x27   :  { %p3759_p4 = pnand %p3757_p3, %p3754_p2 }
  0x29   :  { %3762 = shalt.err (!%p3759_p4)
}
  0x2a   :  { %s3763_s14 = scalar_lea.vmem %s50_s29, 28672  ;;  %p3768_p6 = scmp.lt.s32.totalorder %s50_s29, %s50_s29 }
  0x2b   :  { %p3764_p5 = scmp.ne.s32.totalorder %s50_s29, %s3763_s14  ;;  %p3769_p7 = scmp.lt.s32.totalorder %s3763_s14, %s3763_s14 }
  0x2d   :  { %p3770_p8 = por %p3769_p7, %p3768_p6 }
  0x2f   :  { %p3771_p9 = pnand %p3770_p8, %p3764_p5 }
  0x31   :  { %3774 = shalt.err (!%p3771_p9)
}
  0x32   :  { %s3786_s1 = smov 448   ;;  %s3787_s15 = smov 28  }
  0x33   :  { %55 = dma.hbm_to_vmem [thread:$0]  %s3983_s5, 28672, %s50_s29, [#allocation5], %s3786_s1, %s3786_s1, %s3787_s15  }
  0x34   :  { %3775 = dma.done.wait [#allocation3], 768  }
  0x35   :  { %3776 = vsyncadd [#allocation3], 4294966528 }
  0x36   :  { %3777 = dma.done.wait [#allocation5], 40960  }
  0x37   :  { %3778 = vsyncadd [#allocation5], 4294926336  ;;  %v3788_v0 = vmov 0.0   ;;  %vm3789_vm0 = vmmov 0   ;;  %v3790_v1 = vmov 0   ;;  %v68_v8 = vld [vmem:[%s3978_s0] sm:$0xff]  ;;  %v80_v60 = vlaneseq }
  0x38   :  { %3175 = vmatprep.subr.bf16.mxu1 %v3788_v0  ;;  %3179 = vmatprep.mubr.msk.bf16.mxu1 %vm3789_vm0, %v3788_v0  ;;  %v3223_v2 = vld [vmem:[#allocation2 + $0x4] ss:$12 sps:$4 sm:$0xff]   ;;  %v3225_v3 = vld [vmem:[#allocation2 + $0x8] ss:$12 sps:$4 sm:$0xff]   ;;  %v3226_v4 = vld [vmem:[#allocation2] ss:$12 sps:$4 sm:$0xff]   ;;  %v78_v9 = vpack.c.bf16 %v68_v8, %v68_v8 }
  0x39   :  { %163 = vmatprep.mubr.bf16.mxu0 %v3790_v1  ;;  %131 = vmatprep.subr.bf16.mxu0 %v3223_v2  ;;  %v3227_v5 = vld [vmem:[#allocation2 + $0x1c] ss:$12 sps:$4 sm:$0xff]   ;;  %v3229_v6 = vld [vmem:[#allocation2 + $0x20] ss:$12 sps:$4 sm:$0xff]   ;;  %v3230_v7 = vld [vmem:[#allocation2 + $0x18] ss:$12 sps:$4 sm:$0xff]  }
  0x3a   :  { %3176 = vmatpush3.bf16.msra.mxu1 %v3225_v3  ;;  %132 = vmatpush1.bf16.msra.mxu0 %v3226_v4  ;;  %v3233_v10 = vld [vmem:[#allocation4 + $0x4] ss:$16 sps:$4 sm:$0xff]   ;;  %vm127_vm1 = vcmask 261120   ;;  %v3231_v11 = vld [vmem:[#allocation4] ss:$16 sps:$4 sm:$0xff]   ;;  %v3872_v61 = vshrl.u32 %v80_v60, 7 }
  0x3b   :  { %3177 = vmatprep.subr.bf16.mxu1 %v3788_v0  ;;  %133 = vmatprep.subr.bf16.mxu0 %v3227_v5  ;;  %v3236_v12 = vld [vmem:[#allocation4 + $0x24] ss:$16 sps:$4 sm:$0xff]   ;;  %v3234_v13 = vld [vmem:[#allocation4 + $0x20] ss:$16 sps:$4 sm:$0xff]   ;;  %v3305_v57 = vld [vmem:[#allocation4 + $0xc] ss:$16 sps:$4 sm:$0xff]  }
  0x3c   :  { %v3239_v14 = vld [vmem:[#allocation4 + $0x44] ss:$16 sps:$4 sm:$0xff]   ;;  %v3237_v15 = vld [vmem:[#allocation4 + $0x40] ss:$16 sps:$4 sm:$0xff]   ;;  %v3875_v62 = vsub.s32 2, %v3872_v61  ;;  %v3881_v0 = vsub.s32 0, %v3872_v61 }
  0x3d   :  { %v3255_v16 = vld [vmem:[#allocation4 + $0x200] ss:$16 sps:$4 sm:$0xff]   ;;  %v3257_v17 = vld [vmem:[#allocation4 + $0x204] ss:$16 sps:$4 sm:$0xff]   ;;  %v3884_v2 = vsub.s32 1, %v3872_v61 }
  0x3e   :  { %3178 = vmatpush3.bf16.msra.mxu1 %v3229_v6  ;;  %134 = vmatpush1.bf16.msra.mxu0 %v3230_v7  ;;  %v3242_v18 = vld [vmem:[#allocation4 + $0x64] ss:$16 sps:$4 sm:$0xff]   ;;  %v3261_v19 = vld [vmem:[#allocation4 + $0x220] ss:$16 sps:$4 sm:$0xff]   ;;  %v3335_v60 = vld [vmem:[#allocation4 + $0x14c] ss:$16 sps:$4 sm:$0xff]  }
  0x3f   :  { %816 = vmatprep.subr.bf16.mxu0 %v3233_v10  ;;  %857 = vmatprep.subr.bf16.mxu1 %v3257_v17  ;;  %v3263_v20 = vld [vmem:[#allocation4 + $0x224] ss:$16 sps:$4 sm:$0xff]   ;;  %v3240_v21 = vld [vmem:[#allocation4 + $0x60] ss:$16 sps:$4 sm:$0xff]  }
  0x40   :  { %v3245_v22 = vld [vmem:[#allocation4 + $0x84] ss:$16 sps:$4 sm:$0xff]   ;;  %v3267_v24 = vld [vmem:[#allocation4 + $0x240] ss:$16 sps:$4 sm:$0xff]  }
  0x41   :  { %3180 = vmatmul.mubr.msk.bf16.vlgmr.msra.gmra.mrb[0].mxu1 %vm127_vm1, %v78_v9  ;;  %2806 = vmatmul.mubr.msk.bf16.vlgmr.msra.gmra.mrb[0].mxu0 %vm127_vm1, %v78_v9  ;;  %v3269_v23 = vld [vmem:[#allocation4 + $0x244] ss:$16 sps:$4 sm:$0xff]   ;;  %v3243_v25 = vld [vmem:[#allocation4 + $0x80] ss:$16 sps:$4 sm:$0xff]  }
  0x42   :  { %889 = vmatprep.mubr.bf16.mxu1 %v3790_v1  ;;  %817 = vmatpush1.bf16.msra.mxu0 %v3231_v11  ;;  %v3275_v26 = vld [vmem:[#allocation4 + $0x264] ss:$16 sps:$4 sm:$0xff]   ;;  %v3273_v28 = vld [vmem:[#allocation4 + $0x260] ss:$16 sps:$4 sm:$0xff]  }
  0x43   :  { %818 = vmatprep.subr.bf16.mxu0 %v3236_v12  ;;  %858 = vmatpush1.bf16.msra.mxu1 %v3255_v16  ;;  %v3248_v27 = vld [vmem:[#allocation4 + $0xa4] ss:$16 sps:$4 sm:$0xff]   ;;  %v3246_v29 = vld [vmem:[#allocation4 + $0xa0] ss:$16 sps:$4 sm:$0xff]  }
  0x44   :  { %859 = vmatprep.subr.bf16.mxu1 %v3263_v20  ;;  %v3281_v30 = vld [vmem:[#allocation4 + $0x284] ss:$16 sps:$4 sm:$0xff]   ;;  %v3249_v32 = vld [vmem:[#allocation4 + $0xc0] ss:$16 sps:$4 sm:$0xff]  }
  0x45   :  { %v3251_v31 = vld [vmem:[#allocation4 + $0xc4] ss:$16 sps:$4 sm:$0xff]   ;;  %v3279_v33 = vld [vmem:[#allocation4 + $0x280] ss:$16 sps:$4 sm:$0xff]  }
  0x46   :  { %819 = vmatpush1.bf16.msra.mxu0 %v3234_v13  ;;  %v3254_v34 = vld [vmem:[#allocation4 + $0xe4] ss:$16 sps:$4 sm:$0xff]   ;;  %v3285_v36 = vld [vmem:[#allocation4 + $0x2a0] ss:$16 sps:$4 sm:$0xff]  }
  0x47   :  { %820 = vmatprep.subr.bf16.mxu0 %v3239_v14  ;;  %860 = vmatpush1.bf16.msra.mxu1 %v3261_v19  ;;  %v3287_v35 = vld [vmem:[#allocation4 + $0x2a4] ss:$16 sps:$4 sm:$0xff]   ;;  %v3252_v37 = vld [vmem:[#allocation4 + $0xe0] ss:$16 sps:$4 sm:$0xff]  }
  0x48   :  { %861 = vmatprep.subr.bf16.mxu1 %v3269_v23  ;;  %v3293_v38 = vld [vmem:[#allocation4 + $0x2c4] ss:$16 sps:$4 sm:$0xff]   ;;  %v3291_v40 = vld [vmem:[#allocation4 + $0x2c0] ss:$16 sps:$4 sm:$0xff]  }
  0x49   :  { %v3260_v39 = vld [vmem:[#allocation4 + $0x104] ss:$16 sps:$4 sm:$0xff]   ;;  %v3258_v41 = vld [vmem:[#allocation4 + $0x100] ss:$16 sps:$4 sm:$0xff]  }
  0x4a   :  { %821 = vmatpush1.bf16.msra.mxu0 %v3237_v15  ;;  %v3266_v42 = vld [vmem:[#allocation4 + $0x124] ss:$16 sps:$4 sm:$0xff]   ;;  %v3264_v43 = vld [vmem:[#allocation4 + $0x120] ss:$16 sps:$4 sm:$0xff]  }
  0x4b   :  { %822 = vmatprep.subr.bf16.mxu0 %v3242_v18  ;;  %862 = vmatpush1.bf16.msra.mxu1 %v3267_v24  ;;  %v3272_v44 = vld [vmem:[#allocation4 + $0x144] ss:$16 sps:$4 sm:$0xff]   ;;  %v3270_v45 = vld [vmem:[#allocation4 + $0x140] ss:$16 sps:$4 sm:$0xff]   ;;  %v3303_v18 = vld [vmem:[#allocation4 + $0x8] ss:$16 sps:$4 sm:$0xff]  }
  0x4c   :  { %863 = vmatprep.subr.bf16.mxu1 %v3275_v26  ;;  %v3278_v46 = vld [vmem:[#allocation4 + $0x164] ss:$16 sps:$4 sm:$0xff]   ;;  %v3276_v47 = vld [vmem:[#allocation4 + $0x160] ss:$16 sps:$4 sm:$0xff]   ;;  %v3306_v26 = vld [vmem:[#allocation4 + $0x28] ss:$16 sps:$4 sm:$0xff]  }
  0x4d   :  { %v3284_v48 = vld [vmem:[#allocation4 + $0x184] ss:$16 sps:$4 sm:$0xff]   ;;  %v3282_v49 = vld [vmem:[#allocation4 + $0x180] ss:$16 sps:$4 sm:$0xff]  }
  0x4e   :  { %823 = vmatpush1.bf16.msra.mxu0 %v3240_v21  ;;  %v3290_v50 = vld [vmem:[#allocation4 + $0x1a4] ss:$16 sps:$4 sm:$0xff]   ;;  %v3288_v51 = vld [vmem:[#allocation4 + $0x1a0] ss:$16 sps:$4 sm:$0xff]  }
  0x4f   :  { %824 = vmatprep.subr.bf16.mxu0 %v3245_v22  ;;  %864 = vmatpush1.bf16.msra.mxu1 %v3273_v28  ;;  %v3296_v52 = vld [vmem:[#allocation4 + $0x1c4] ss:$16 sps:$4 sm:$0xff]   ;;  %v3294_v54 = vld [vmem:[#allocation4 + $0x1c0] ss:$16 sps:$4 sm:$0xff]   ;;  %v3308_v22 = vld [vmem:[#allocation4 + $0x2c] ss:$16 sps:$4 sm:$0xff]  }
  0x50   :  { %865 = vmatprep.subr.bf16.mxu1 %v3281_v30  ;;  %v3299_v53 = vld [vmem:[#allocation4 + $0x2e4] ss:$16 sps:$4 sm:$0xff]   ;;  %v3297_v55 = vld [vmem:[#allocation4 + $0x2e0] ss:$16 sps:$4 sm:$0xff]   ;;  %v3311_v28 = vld [vmem:[#allocation4 + $0x4c] ss:$16 sps:$4 sm:$0xff]  }
  0x51   :  { %v3302_v56 = vld [vmem:[#allocation4 + $0x1e4] ss:$16 sps:$4 sm:$0xff]   ;;  %v3300_v58 = vld [vmem:[#allocation4 + $0x1e0] ss:$16 sps:$4 sm:$0xff]   ;;  %v3309_v30 = vld [vmem:[#allocation4 + $0x48] ss:$16 sps:$4 sm:$0xff]  }
  0x52   :  { %825 = vmatpush1.bf16.msra.mxu0 %v3243_v25  ;;  %v3377_v59 = vld [vmem:[#allocation6 + $0x4] ss:$28 sps:$4 sm:$0xff]   ;;  %v77_v63 = vld [vmem:[%s3980_s2] sm:$0x7] }
  0x53   :  { %826 = vmatprep.subr.bf16.mxu0 %v3248_v27  ;;  %866 = vmatpush1.bf16.msra.mxu1 %v3279_v33  ;;  %v91_v3 = vrot.slane %v77_v63, %v3875_v62  ;;  %v83_v4 = vrot.slane %v77_v63, %v3881_v0  ;;  %v87_v5 = vrot.slane %v77_v63, %v3884_v2  ;;  %v3375_v25 = vld [vmem:[#allocation6] ss:$28 sps:$4 sm:$0xff]   ;;  %v3387_v33 = vld [vmem:[#allocation6 + $0x70] ss:$28 sps:$4 sm:$0xff]   ;;  %v3429_v63 = vld [vmem:[#allocation6 + $0x1f8] ss:$28 sps:$4 sm:$0xff]  }
  0x54   :  { %867 = vmatprep.subr.bf16.mxu1 %v3287_v35  ;;  %v3383_v27 = vld [vmem:[#allocation6 + $0x3c] ss:$28 sps:$4 sm:$0xff]   ;;  %v3395_v35 = vld [vmem:[#allocation6 + $0xac] ss:$28 sps:$4 sm:$0xff]  }
  0x56   :  { %827 = vmatpush1.bf16.msra.mxu0 %v3246_v29  ;;  %v3381_v29 = vld [vmem:[#allocation6 + $0x38] ss:$28 sps:$4 sm:$0xff]  }
  0x57   :  { %828 = vmatprep.subr.bf16.mxu0 %v3251_v31  ;;  %868 = vmatpush1.bf16.msra.mxu1 %v3285_v36  ;;  %v3389_v31 = vld [vmem:[#allocation6 + $0x74] ss:$28 sps:$4 sm:$0xff]   ;;  %v3317_v36 = vld [vmem:[#allocation4 + $0x8c] ss:$16 sps:$4 sm:$0xff]  }
  0x58   :  { %869 = vmatprep.subr.bf16.mxu1 %v3293_v38  ;;  %v3315_v38 = vld [vmem:[#allocation4 + $0x88] ss:$16 sps:$4 sm:$0xff]  }
  0x5a   :  { %829 = vmatpush1.bf16.msra.mxu0 %v3249_v32  ;;  %v3314_v32 = vld [vmem:[#allocation4 + $0x6c] ss:$16 sps:$4 sm:$0xff]  }
  0x5b   :  { %830 = vmatprep.subr.bf16.mxu0 %v3254_v34  ;;  %870 = vmatpush1.bf16.msra.mxu1 %v3291_v40  ;;  %v3312_v34 = vld [vmem:[#allocation4 + $0x68] ss:$16 sps:$4 sm:$0xff]   ;;  %v3320_v40 = vld [vmem:[#allocation4 + $0xac] ss:$16 sps:$4 sm:$0xff]  }
  0x5c   :  { %871 = vmatprep.subr.bf16.mxu1 %v3299_v53  ;;  %v3417_v53 = vld [vmem:[#allocation6 + $0x188] ss:$28 sps:$4 sm:$0xff]  }
  0x5e   :  { %831 = vmatpush1.bf16.msra.mxu0 %v3252_v37  ;;  %v3393_v37 = vld [vmem:[#allocation6 + $0xa8] ss:$28 sps:$4 sm:$0xff]  }
  0x5f   :  { %832 = vmatprep.subr.bf16.mxu0 %v3260_v39  ;;  %872 = vmatpush1.bf16.msra.mxu1 %v3297_v55  ;;  %v3401_v39 = vld [vmem:[#allocation6 + $0xe4] ss:$28 sps:$4 sm:$0xff]  }
  0x60   :  { %898 = vmatprep.subr.bf16.mxu1 %v3305_v57  ;;  %v3425_v55 = vld [vmem:[#allocation6 + $0x1c4] ss:$28 sps:$4 sm:$0xff]  }
  0x61   :  { %v3423_v57 = vld [vmem:[#allocation6 + $0x1c0] ss:$28 sps:$4 sm:$0xff]  }
  0x62   :  { %833 = vmatpush1.bf16.msra.mxu0 %v3258_v41  ;;  %v3399_v41 = vld [vmem:[#allocation6 + $0xe0] ss:$28 sps:$4 sm:$0xff]  }
  0x63   :  { %834 = vmatprep.subr.bf16.mxu0 %v3266_v42  ;;  %v3318_v42 = vld [vmem:[#allocation4 + $0xa8] ss:$16 sps:$4 sm:$0xff]  }
  0x66   :  { %835 = vmatpush1.bf16.msra.mxu0 %v3264_v43  ;;  %v3407_v43 = vld [vmem:[#allocation6 + $0x11c] ss:$28 sps:$4 sm:$0xff]  }
  0x67   :  { %836 = vmatprep.subr.bf16.mxu0 %v3272_v44  ;;  %v3323_v44 = vld [vmem:[#allocation4 + $0xcc] ss:$16 sps:$4 sm:$0xff]  }
  0x6a   :  { %837 = vmatpush1.bf16.msra.mxu0 %v3270_v45  ;;  %v3405_v45 = vld [vmem:[#allocation6 + $0x118] ss:$28 sps:$4 sm:$0xff]  }
  0x6b   :  { %838 = vmatprep.subr.bf16.mxu0 %v3278_v46  ;;  %v3321_v46 = vld [vmem:[#allocation4 + $0xc8] ss:$16 sps:$4 sm:$0xff]  }
  0x6e   :  { %839 = vmatpush1.bf16.msra.mxu0 %v3276_v47  ;;  %v3413_v47 = vld [vmem:[#allocation6 + $0x154] ss:$28 sps:$4 sm:$0xff]  }
  0x6f   :  { %840 = vmatprep.subr.bf16.mxu0 %v3284_v48  ;;  %v3326_v48 = vld [vmem:[#allocation4 + $0xec] ss:$16 sps:$4 sm:$0xff]  }
  0x72   :  { %841 = vmatpush1.bf16.msra.mxu0 %v3282_v49  ;;  %v3411_v49 = vld [vmem:[#allocation6 + $0x150] ss:$28 sps:$4 sm:$0xff]  }
  0x73   :  { %842 = vmatprep.subr.bf16.mxu0 %v3290_v50  ;;  %v3324_v50 = vld [vmem:[#allocation4 + $0xe8] ss:$16 sps:$4 sm:$0xff]  }
  0x76   :  { %843 = vmatpush1.bf16.msra.mxu0 %v3288_v51  ;;  %v3419_v51 = vld [vmem:[#allocation6 + $0x18c] ss:$28 sps:$4 sm:$0xff]  }
  0x77   :  { %844 = vmatprep.subr.bf16.mxu0 %v3296_v52  ;;  %v3329_v52 = vld [vmem:[#allocation4 + $0x10c] ss:$16 sps:$4 sm:$0xff]  }
  0x7a   :  { %845 = vmatpush1.bf16.msra.mxu0 %v3294_v54  ;;  %v3327_v54 = vld [vmem:[#allocation4 + $0x108] ss:$16 sps:$4 sm:$0xff]  }
  0x7b   :  { %846 = vmatprep.subr.bf16.mxu0 %v3302_v56  ;;  %v3332_v56 = vld [vmem:[#allocation4 + $0x12c] ss:$16 sps:$4 sm:$0xff]  }
  0x7e   :  { %847 = vmatpush1.bf16.msra.mxu0 %v3300_v58  ;;  %v3330_v58 = vld [vmem:[#allocation4 + $0x128] ss:$16 sps:$4 sm:$0xff]  }
  0x7f   :  { %2433 = vmatprep.subr.bf16.mxu0 %v3377_v59  ;;  %v3431_v59 = vld [vmem:[#allocation6 + $0x1fc] ss:$28 sps:$4 sm:$0xff]  }
 0x114   :  { %v206_v6 = vpop.f32.mrb[0].mxu1  ;;  %v165_v8 = vpop.f32.mrb[0].mxu0 }
 0x115   :  { %v207_v7 = vadd.f32 %v206_v6, %v91_v3  ;;  %v3181_v9 = vpop.f32.mrb[1].mxu1  ;;  %v166_v10 = vadd.f32 %v165_v8, %v83_v4  ;;  %v167_v11 = vpop.f32.mrb[1].mxu0  ;;  %v3333_v3 = vld [vmem:[#allocation4 + $0x148] ss:$16 sps:$4 sm:$0xff]   ;;  %v3437_v4 = vld [vmem:[#allocation6 + $0x234] ss:$28 sps:$4 sm:$0xff]  }
 0x116   :  { %v209_v12 = vpop.f32.mrb[2].mxu1  ;;  %v168_v14 = vadd.f32 %v167_v11, %v87_v5  ;;  %v169_v16 = vpop.f32.mrb[2].mxu0  ;;  %v3338_v5 = vld [vmem:[#allocation4 + $0x16c] ss:$16 sps:$4 sm:$0xff]   ;;  %v3339_v11 = vld [vmem:[#allocation4 + $0x188] ss:$16 sps:$4 sm:$0xff]  }
 0x117   :  { %v214_v13 = vmax.f32 %v207_v7, 0.0  ;;  %v3182_v15 = vpop.f32.mrb[3].mxu1  ;;  %v212_v17 = vmax.f32 %v166_v10, 0.0  ;;  %v170_v19 = vpop.f32.mrb[3].mxu0  ;;  %v3435_v6 = vld [vmem:[#allocation6 + $0x230] ss:$28 sps:$4 sm:$0xff]  }
 0x118   :  { %v213_v21 = vmax.f32 %v168_v14, 0.0  ;;  %v3336_v7 = vld [vmem:[#allocation4 + $0x168] ss:$16 sps:$4 sm:$0xff]   ;;  %v3341_v9 = vld [vmem:[#allocation4 + $0x18c] ss:$16 sps:$4 sm:$0xff]  }
 0x119   :  { %v3889_v20 = vpack.c.bf16 %v214_v13, %v214_v13  ;;  %v3891_v23 = vpack.c.bf16 %v212_v17, %v212_v17  ;;  %v3443_v8 = vld [vmem:[#allocation6 + $0x26c] ss:$28 sps:$4 sm:$0xff]   ;;  %v3449_v12 = vld [vmem:[#allocation6 + $0x2a4] ss:$28 sps:$4 sm:$0xff]  }
 0x11a   :  { %v313_v24 = vpack.c.bf16 %v213_v21, %v213_v21  ;;  %v3441_v10 = vld [vmem:[#allocation6 + $0x268] ss:$28 sps:$4 sm:$0xff]   ;;  %v3344_v13 = vld [vmem:[#allocation4 + $0x1ac] ss:$16 sps:$4 sm:$0xff]  }
 0x11b   :  { %890 = vmatmul.mubr.bf16.vlgmr.msra.gmra.mrb[4].mxu1 %v3889_v20  ;;  %v3447_v14 = vld [vmem:[#allocation6 + $0x2a0] ss:$28 sps:$4 sm:$0xff]   ;;  %v3342_v15 = vld [vmem:[#allocation4 + $0x1a8] ss:$16 sps:$4 sm:$0xff]  }
 0x11c   :  { %899 = vmatpush1.bf16.msra.mxu1 %v3303_v18  ;;  %848 = vmatprep.mubr.bf16.mxu0 %v313_v24  ;;  %v3347_v16 = vld [vmem:[#allocation4 + $0x1cc] ss:$16 sps:$4 sm:$0xff]   ;;  %v3345_v17 = vld [vmem:[#allocation4 + $0x1c8] ss:$16 sps:$4 sm:$0xff]  }
 0x11d   :  { %900 = vmatprep.subr.bf16.mxu1 %v3308_v22  ;;  %849 = vmatmul.mubr.bf16.vlgmr.msra.gmra.mrb[4].mxu0 %v3891_v23  ;;  %v3350_v18 = vld [vmem:[#allocation4 + $0x1ec] ss:$16 sps:$4 sm:$0xff]   ;;  %v3348_v19 = vld [vmem:[#allocation4 + $0x1e8] ss:$16 sps:$4 sm:$0xff]  }
 0x11e   :  { %930 = vmatprep.mubr.bf16.mxu1 %v313_v24  ;;  %2434 = vmatpush1.bf16.msra.mxu0 %v3375_v25  ;;  %v3353_v21 = vld [vmem:[#allocation4 + $0x20c] ss:$16 sps:$4 sm:$0xff]   ;;  %v3351_v22 = vld [vmem:[#allocation4 + $0x208] ss:$16 sps:$4 sm:$0xff]  }
 0x11f   :  { %2435 = vmatprep.subr.bf16.mxu0 %v3383_v27  ;;  %v3356_v24 = vld [vmem:[#allocation4 + $0x22c] ss:$16 sps:$4 sm:$0xff]   ;;  %v3354_v25 = vld [vmem:[#allocation4 + $0x228] ss:$16 sps:$4 sm:$0xff]  }
 0x120   :  { %901 = vmatpush1.bf16.msra.mxu1 %v3306_v26  ;;  %v3359_v26 = vld [vmem:[#allocation4 + $0x24c] ss:$16 sps:$4 sm:$0xff]   ;;  %v3357_v27 = vld [vmem:[#allocation4 + $0x248] ss:$16 sps:$4 sm:$0xff]  }
 0x121   :  { %902 = vmatprep.subr.bf16.mxu1 %v3311_v28  ;;  %v3362_v28 = vld [vmem:[#allocation4 + $0x26c] ss:$16 sps:$4 sm:$0xff]  }
 0x122   :  { %2436 = vmatpush1.bf16.msra.mxu0 %v3381_v29  ;;  %v3360_v29 = vld [vmem:[#allocation4 + $0x268] ss:$16 sps:$4 sm:$0xff]  }
 0x123   :  { %2437 = vmatprep.subr.bf16.mxu0 %v3389_v31  ;;  %v3363_v31 = vld [vmem:[#allocation4 + $0x288] ss:$16 sps:$4 sm:$0xff]  }
 0x124   :  { %903 = vmatpush1.bf16.msra.mxu1 %v3309_v30  ;;  %v3365_v30 = vld [vmem:[#allocation4 + $0x28c] ss:$16 sps:$4 sm:$0xff]  }
 0x125   :  { %904 = vmatprep.subr.bf16.mxu1 %v3314_v32  ;;  %v3368_v32 = vld [vmem:[#allocation4 + $0x2ac] ss:$16 sps:$4 sm:$0xff]  }
 0x126   :  { %2438 = vmatpush1.bf16.msra.mxu0 %v3387_v33  ;;  %v3371_v33 = vld [vmem:[#allocation4 + $0x2cc] ss:$16 sps:$4 sm:$0xff]  }
 0x127   :  { %2439 = vmatprep.subr.bf16.mxu0 %v3395_v35  ;;  %v3453_v35 = vld [vmem:[#allocation6 + $0x2d8] ss:$28 sps:$4 sm:$0xff]  }
 0x128   :  { %905 = vmatpush1.bf16.msra.mxu1 %v3312_v34  ;;  %v3455_v34 = vld [vmem:[#allocation6 + $0x2dc] ss:$28 sps:$4 sm:$0xff]  }
 0x129   :  { %906 = vmatprep.subr.bf16.mxu1 %v3317_v36  ;;  %v3374_v36 = vld [vmem:[#allocation4 + $0x2ec] ss:$16 sps:$4 sm:$0xff]  }
 0x12a   :  { %2440 = vmatpush1.bf16.msra.mxu0 %v3393_v37  ;;  %v3461_v37 = vld [vmem:[#allocation6 + $0x314] ss:$28 sps:$4 sm:$0xff]  }
 0x12b   :  { %2441 = vmatprep.subr.bf16.mxu0 %v3401_v39  ;;  %v3459_v39 = vld [vmem:[#allocation6 + $0x310] ss:$28 sps:$4 sm:$0xff]  }
 0x12c   :  { %907 = vmatpush1.bf16.msra.mxu1 %v3315_v38  ;;  %v3372_v38 = vld [vmem:[#allocation4 + $0x2e8] ss:$16 sps:$4 sm:$0xff]  }
 0x12d   :  { %908 = vmatprep.subr.bf16.mxu1 %v3320_v40  ;;  %v3380_v40 = vld [vmem:[#allocation6 + $0xc] ss:$28 sps:$4 sm:$0xff]  }
 0x12e   :  { %2442 = vmatpush1.bf16.msra.mxu0 %v3399_v41  ;;  %v3467_v41 = vld [vmem:[#allocation6 + $0x34c] ss:$28 sps:$4 sm:$0xff]  }
 0x12f   :  { %2443 = vmatprep.subr.bf16.mxu0 %v3407_v43  ;;  %v3465_v43 = vld [vmem:[#allocation6 + $0x348] ss:$28 sps:$4 sm:$0xff]  }
 0x130   :  { %909 = vmatpush1.bf16.msra.mxu1 %v3318_v42  ;;  %v3378_v42 = vld [vmem:[#allocation6 + $0x8] ss:$28 sps:$4 sm:$0xff]  }
 0x131   :  { %910 = vmatprep.subr.bf16.mxu1 %v3323_v44  ;;  %v3386_v44 = vld [vmem:[#allocation6 + $0x44] ss:$28 sps:$4 sm:$0xff]  }
 0x132   :  { %2444 = vmatpush1.bf16.msra.mxu0 %v3405_v45  ;;  %v3384_v45 = vld [vmem:[#allocation6 + $0x40] ss:$28 sps:$4 sm:$0xff]  }
 0x133   :  { %2445 = vmatprep.subr.bf16.mxu0 %v3413_v47  ;;  %v3392_v47 = vld [vmem:[#allocation6 + $0x7c] ss:$28 sps:$4 sm:$0xff]  }
 0x134   :  { %911 = vmatpush1.bf16.msra.mxu1 %v3321_v46  ;;  %v3473_v46 = vld [vmem:[#allocation6 + $0x384] ss:$28 sps:$4 sm:$0xff]  }
 0x135   :  { %912 = vmatprep.subr.bf16.mxu1 %v3326_v48  ;;  %v3390_v48 = vld [vmem:[#allocation6 + $0x78] ss:$28 sps:$4 sm:$0xff]  }
 0x136   :  { %2446 = vmatpush1.bf16.msra.mxu0 %v3411_v49  ;;  %v3398_v49 = vld [vmem:[#allocation6 + $0xb4] ss:$28 sps:$4 sm:$0xff]  }
 0x137   :  { %2447 = vmatprep.subr.bf16.mxu0 %v3419_v51  ;;  %v3404_v51 = vld [vmem:[#allocation6 + $0xec] ss:$28 sps:$4 sm:$0xff]  }
 0x138   :  { %913 = vmatpush1.bf16.msra.mxu1 %v3324_v50  ;;  %v3396_v50 = vld [vmem:[#allocation6 + $0xb0] ss:$28 sps:$4 sm:$0xff]  }
 0x139   :  { %914 = vmatprep.subr.bf16.mxu1 %v3329_v52  ;;  %v3402_v52 = vld [vmem:[#allocation6 + $0xe8] ss:$28 sps:$4 sm:$0xff]  }
 0x13a   :  { %2448 = vmatpush1.bf16.msra.mxu0 %v3417_v53  ;;  %v3410_v53 = vld [vmem:[#allocation6 + $0x124] ss:$28 sps:$4 sm:$0xff]  }
 0x13b   :  { %2449 = vmatprep.subr.bf16.mxu0 %v3425_v55  ;;  %v3414_v55 = vld [vmem:[#allocation6 + $0x158] ss:$28 sps:$4 sm:$0xff]  }
 0x13c   :  { %915 = vmatpush1.bf16.msra.mxu1 %v3327_v54  ;;  %v3416_v54 = vld [vmem:[#allocation6 + $0x15c] ss:$28 sps:$4 sm:$0xff]  }
 0x13d   :  { %916 = vmatprep.subr.bf16.mxu1 %v3332_v56  ;;  %v3422_v56 = vld [vmem:[#allocation6 + $0x194] ss:$28 sps:$4 sm:$0xff]  }
 0x13e   :  { %2450 = vmatpush1.bf16.msra.mxu0 %v3423_v57  ;;  %v3420_v57 = vld [vmem:[#allocation6 + $0x190] ss:$28 sps:$4 sm:$0xff]  }
 0x13f   :  { %2451 = vmatprep.subr.bf16.mxu0 %v3431_v59  ;;  %v3426_v59 = vld [vmem:[#allocation6 + $0x1c8] ss:$28 sps:$4 sm:$0xff]  }
 0x140   :  { %917 = vmatpush1.bf16.msra.mxu1 %v3330_v58  ;;  %v3428_v58 = vld [vmem:[#allocation6 + $0x1cc] ss:$28 sps:$4 sm:$0xff]  }
 0x141   :  { %918 = vmatprep.subr.bf16.mxu1 %v3335_v60  ;;  %v3434_v60 = vld [vmem:[#allocation6 + $0x204] ss:$28 sps:$4 sm:$0xff]  }
 0x142   :  { %2452 = vmatpush1.bf16.msra.mxu0 %v3429_v63  ;;  %v3432_v63 = vld [vmem:[#allocation6 + $0x200] ss:$28 sps:$4 sm:$0xff]  }
 0x143   :  { %2453 = vmatprep.subr.bf16.mxu0 %v3437_v4  ;;  %v3438_v4 = vld [vmem:[#allocation6 + $0x238] ss:$28 sps:$4 sm:$0xff]  }
 0x144   :  { %919 = vmatpush1.bf16.msra.mxu1 %v3333_v3  ;;  %v3440_v3 = vld [vmem:[#allocation6 + $0x23c] ss:$28 sps:$4 sm:$0xff]  }
 0x145   :  { %920 = vmatprep.subr.bf16.mxu1 %v3338_v5  ;;  %v3446_v5 = vld [vmem:[#allocation6 + $0x274] ss:$28 sps:$4 sm:$0xff]  }
 0x146   :  { %2454 = vmatpush1.bf16.msra.mxu0 %v3435_v6  ;;  %v3444_v6 = vld [vmem:[#allocation6 + $0x270] ss:$28 sps:$4 sm:$0xff]  }
 0x147   :  { %2455 = vmatprep.subr.bf16.mxu0 %v3443_v8  ;;  %v3450_v8 = vld [vmem:[#allocation6 + $0x2a8] ss:$28 sps:$4 sm:$0xff]  }
 0x148   :  { %921 = vmatpush1.bf16.msra.mxu1 %v3336_v7  ;;  %v3452_v7 = vld [vmem:[#allocation6 + $0x2ac] ss:$28 sps:$4 sm:$0xff]  }
 0x149   :  { %922 = vmatprep.subr.bf16.mxu1 %v3341_v9  ;;  %v3458_v9 = vld [vmem:[#allocation6 + $0x2e4] ss:$28 sps:$4 sm:$0xff]  }
 0x14a   :  { %2456 = vmatpush1.bf16.msra.mxu0 %v3441_v10  ;;  %v3456_v10 = vld [vmem:[#allocation6 + $0x2e0] ss:$28 sps:$4 sm:$0xff]  }
 0x14b   :  { %2457 = vmatprep.subr.bf16.mxu0 %v3449_v12  ;;  %v3462_v12 = vld [vmem:[#allocation6 + $0x318] ss:$28 sps:$4 sm:$0xff]  }
 0x14c   :  { %923 = vmatpush1.bf16.msra.mxu1 %v3339_v11  ;;  %v3464_v11 = vld [vmem:[#allocation6 + $0x31c] ss:$28 sps:$4 sm:$0xff]  }
 0x14d   :  { %924 = vmatprep.subr.bf16.mxu1 %v3344_v13  ;;  %v3470_v13 = vld [vmem:[#allocation6 + $0x354] ss:$28 sps:$4 sm:$0xff]  }
 0x14e   :  { %2458 = vmatpush1.bf16.msra.mxu0 %v3447_v14  ;;  %v3468_v14 = vld [vmem:[#allocation6 + $0x350] ss:$28 sps:$4 sm:$0xff]  }
 0x14f   :  { %2459 = vmatprep.subr.bf16.mxu0 %v3455_v34 }
 0x150   :  { %925 = vmatpush1.bf16.msra.mxu1 %v3342_v15  ;;  %v3476_v15 = vld [vmem:[#allocation6 + $0x38c] ss:$28 sps:$4 sm:$0xff]  }
 0x151   :  { %926 = vmatprep.subr.bf16.mxu1 %v3347_v16  ;;  %v3901_v16 = vld [vmem:[%s3982_s4] sm:$0xf] }
 0x152   :  { %2460 = vmatpush1.bf16.msra.mxu0 %v3453_v35  ;;  %v3474_v35 = vld [vmem:[#allocation6 + $0x388] ss:$28 sps:$4 sm:$0xff]  }
 0x153   :  { %2461 = vmatprep.subr.bf16.mxu0 %v3461_v37  ;;  %v3479_v37 = vld [vmem:[#allocation6 + $0x3bc] ss:$28 sps:$4 sm:$0xff]  }
 0x154   :  { %927 = vmatpush1.bf16.msra.mxu1 %v3345_v17 }
 0x155   :  { %928 = vmatprep.subr.bf16.mxu1 %v3350_v18  ;;  %v319_v18 = vrot.slane %v3901_v16, %v3881_v0 }
 0x156   :  { %2462 = vmatpush1.bf16.msra.mxu0 %v3459_v39  ;;  %v3477_v39 = vld [vmem:[#allocation6 + $0x3b8] ss:$28 sps:$4 sm:$0xff]  }
 0x157   :  { %2463 = vmatprep.subr.bf16.mxu0 %v3467_v41  ;;  %v3485_v41 = vld [vmem:[#allocation6 + $0x3f4] ss:$28 sps:$4 sm:$0xff]  }
 0x158   :  { %929 = vmatpush1.bf16.msra.mxu1 %v3348_v19 }
 0x159   :  { %939 = vmatprep.subr.bf16.mxu1 %v3353_v21  ;;  %v323_v21 = vrot.slane %v3901_v16, %v3884_v2 }
 0x15a   :  { %2464 = vmatpush1.bf16.msra.mxu0 %v3465_v43  ;;  %v3483_v43 = vld [vmem:[#allocation6 + $0x3f0] ss:$28 sps:$4 sm:$0xff]  }
 0x15b   :  { %931 = vmatmul.mubr.bf16.vlgmr.msra.gmra.mrb[8].mxu1 %v3891_v23  ;;  %v3366_v23 = vld [vmem:[#allocation4 + $0x2a8] ss:$16 sps:$4 sm:$0xff]   ;;  %2474 = vmatprep.subr.bf16.mxu0 %v3473_v46  ;;  %v3494_v46 = vld [vmem:[#allocation6 + $0x434] ss:$28 sps:$4 sm:$0xff]  }
 0x15c   :  { %940 = vmatpush1.bf16.msra.mxu1 %v3351_v22  ;;  %971 = vmatprep.mubr.bf16.mxu1 %v3790_v1  ;;  %v3369_v1 = vld [vmem:[#allocation4 + $0x2c8] ss:$16 sps:$4 sm:$0xff]  }
 0x15d   :  { %941 = vmatprep.subr.bf16.mxu1 %v3356_v24 }
 0x160   :  { %942 = vmatpush1.bf16.msra.mxu1 %v3354_v25 }
 0x161   :  { %943 = vmatprep.subr.bf16.mxu1 %v3359_v26 }
 0x164   :  { %944 = vmatpush1.bf16.msra.mxu1 %v3357_v27 }
 0x165   :  { %945 = vmatprep.subr.bf16.mxu1 %v3362_v28 }
 0x168   :  { %946 = vmatpush1.bf16.msra.mxu1 %v3360_v29 }
 0x169   :  { %947 = vmatprep.subr.bf16.mxu1 %v3365_v30 }
 0x16c   :  { %948 = vmatpush1.bf16.msra.mxu1 %v3363_v31 }
 0x16d   :  { %949 = vmatprep.subr.bf16.mxu1 %v3368_v32 }
 0x170   :  { %950 = vmatpush1.bf16.msra.mxu1 %v3366_v23 }
 0x171   :  { %951 = vmatprep.subr.bf16.mxu1 %v3371_v33 }
 0x174   :  { %952 = vmatpush1.bf16.msra.mxu1 %v3369_v1  ;;  %v3471_v1 = vld [vmem:[#allocation6 + $0x380] ss:$28 sps:$4 sm:$0xff]  }
 0x175   :  { %953 = vmatprep.subr.bf16.mxu1 %v3374_v36 }
 0x178   :  { %954 = vmatpush1.bf16.msra.mxu1 %v3372_v38  ;;  %v3482_v38 = vld [vmem:[#allocation6 + $0x3c4] ss:$28 sps:$4 sm:$0xff]  }
 0x179   :  { %2515 = vmatprep.subr.bf16.mxu1 %v3380_v40  ;;  %v3480_v40 = vld [vmem:[#allocation6 + $0x3c0] ss:$28 sps:$4 sm:$0xff]  }
 0x17b   :  { %972 = vmatmul.mubr.bf16.vlgmr.msra.gmra.mrb[8].mxu1 %v3889_v20  ;;  %v3408_v20 = vld [vmem:[#allocation6 + $0x120] ss:$28 sps:$4 sm:$0xff]  }
 0x17c   :  { %2516 = vmatpush1.bf16.msra.mxu1 %v3378_v42  ;;  %v3488_v42 = vld [vmem:[#allocation6 + $0x3fc] ss:$28 sps:$4 sm:$0xff]  }
 0x17d   :  { %2517 = vmatprep.subr.bf16.mxu1 %v3386_v44  ;;  %v3486_v44 = vld [vmem:[#allocation6 + $0x3f8] ss:$28 sps:$4 sm:$0xff]  }
 0x180   :  { %2518 = vmatpush1.bf16.msra.mxu1 %v3384_v45  ;;  %v3491_v45 = vld [vmem:[#allocation6 + $0x42c] ss:$28 sps:$4 sm:$0xff]  }
 0x181   :  { %2519 = vmatprep.subr.bf16.mxu1 %v3392_v47  ;;  %v3489_v47 = vld [vmem:[#allocation6 + $0x428] ss:$28 sps:$4 sm:$0xff]  }
 0x184   :  { %2520 = vmatpush1.bf16.msra.mxu1 %v3390_v48  ;;  %v3492_v48 = vld [vmem:[#allocation6 + $0x430] ss:$28 sps:$4 sm:$0xff]  }
 0x185   :  { %2521 = vmatprep.subr.bf16.mxu1 %v3398_v49  ;;  %v3497_v49 = vld [vmem:[#allocation6 + $0x464] ss:$28 sps:$4 sm:$0xff]  }
 0x188   :  { %2522 = vmatpush1.bf16.msra.mxu1 %v3396_v50  ;;  %v3500_v50 = vld [vmem:[#allocation6 + $0x46c] ss:$28 sps:$4 sm:$0xff]  }
 0x189   :  { %2523 = vmatprep.subr.bf16.mxu1 %v3404_v51  ;;  %v3495_v51 = vld [vmem:[#allocation6 + $0x460] ss:$28 sps:$4 sm:$0xff]  }
 0x18c   :  { %2524 = vmatpush1.bf16.msra.mxu1 %v3402_v52  ;;  %v3498_v52 = vld [vmem:[#allocation6 + $0x468] ss:$28 sps:$4 sm:$0xff]  }
 0x18d   :  { %2525 = vmatprep.subr.bf16.mxu1 %v3410_v53  ;;  %v3503_v53 = vld [vmem:[#allocation6 + $0x49c] ss:$28 sps:$4 sm:$0xff]  }
 0x190   :  { %2526 = vmatpush1.bf16.msra.mxu1 %v3408_v20  ;;  %v3506_v20 = vld [vmem:[#allocation6 + $0x4a4] ss:$28 sps:$4 sm:$0xff]  }
 0x191   :  { %2527 = vmatprep.subr.bf16.mxu1 %v3416_v54  ;;  %v3501_v54 = vld [vmem:[#allocation6 + $0x498] ss:$28 sps:$4 sm:$0xff]  }
 0x194   :  { %2528 = vmatpush1.bf16.msra.mxu1 %v3414_v55  ;;  %v3504_v55 = vld [vmem:[#allocation6 + $0x4a0] ss:$28 sps:$4 sm:$0xff]  }
 0x195   :  { %2529 = vmatprep.subr.bf16.mxu1 %v3422_v56  ;;  %v3509_v56 = vld [vmem:[#allocation6 + $0x4d4] ss:$28 sps:$4 sm:$0xff]  }
 0x198   :  { %2530 = vmatpush1.bf16.msra.mxu1 %v3420_v57  ;;  %v3512_v57 = vld [vmem:[#allocation6 + $0x4dc] ss:$28 sps:$4 sm:$0xff]  }
 0x199   :  { %2531 = vmatprep.subr.bf16.mxu1 %v3428_v58  ;;  %v3507_v58 = vld [vmem:[#allocation6 + $0x4d0] ss:$28 sps:$4 sm:$0xff]  }
 0x19c   :  { %2532 = vmatpush1.bf16.msra.mxu1 %v3426_v59  ;;  %v3510_v59 = vld [vmem:[#allocation6 + $0x4d8] ss:$28 sps:$4 sm:$0xff]  }
 0x19d   :  { %2533 = vmatprep.subr.bf16.mxu1 %v3434_v60  ;;  %v3515_v60 = vld [vmem:[#allocation6 + $0x50c] ss:$28 sps:$4 sm:$0xff]  }
 0x1a0   :  { %2534 = vmatpush1.bf16.msra.mxu1 %v3432_v63  ;;  %v3518_v63 = vld [vmem:[#allocation6 + $0x514] ss:$28 sps:$4 sm:$0xff]  }
 0x1a1   :  { %2535 = vmatprep.subr.bf16.mxu1 %v3440_v3  ;;  %v3513_v3 = vld [vmem:[#allocation6 + $0x508] ss:$28 sps:$4 sm:$0xff]  }
 0x1a4   :  { %2536 = vmatpush1.bf16.msra.mxu1 %v3438_v4  ;;  %v3516_v4 = vld [vmem:[#allocation6 + $0x510] ss:$28 sps:$4 sm:$0xff]  }
 0x1a5   :  { %2537 = vmatprep.subr.bf16.mxu1 %v3446_v5  ;;  %v3521_v5 = vld [vmem:[#allocation6 + $0x544] ss:$28 sps:$4 sm:$0xff]  }
 0x1a8   :  { %2538 = vmatpush1.bf16.msra.mxu1 %v3444_v6  ;;  %v3524_v6 = vld [vmem:[#allocation6 + $0x54c] ss:$28 sps:$4 sm:$0xff]  }
 0x1a9   :  { %2539 = vmatprep.subr.bf16.mxu1 %v3452_v7  ;;  %v3519_v7 = vld [vmem:[#allocation6 + $0x540] ss:$28 sps:$4 sm:$0xff]  }
 0x1ac   :  { %2540 = vmatpush1.bf16.msra.mxu1 %v3450_v8  ;;  %v3522_v8 = vld [vmem:[#allocation6 + $0x548] ss:$28 sps:$4 sm:$0xff]  }
 0x1ad   :  { %2541 = vmatprep.subr.bf16.mxu1 %v3458_v9  ;;  %v3527_v9 = vld [vmem:[#allocation6 + $0x57c] ss:$28 sps:$4 sm:$0xff]  }
 0x1b0   :  { %2542 = vmatpush1.bf16.msra.mxu1 %v3456_v10  ;;  %v3530_v10 = vld [vmem:[#allocation6 + $0x584] ss:$28 sps:$4 sm:$0xff]  }
 0x1b1   :  { %2543 = vmatprep.subr.bf16.mxu1 %v3464_v11  ;;  %v3525_v11 = vld [vmem:[#allocation6 + $0x578] ss:$28 sps:$4 sm:$0xff]  }
 0x1b4   :  { %2544 = vmatpush1.bf16.msra.mxu1 %v3462_v12  ;;  %v3528_v12 = vld [vmem:[#allocation6 + $0x580] ss:$28 sps:$4 sm:$0xff]  }
 0x1b5   :  { %2545 = vmatprep.subr.bf16.mxu1 %v3470_v13  ;;  %v3533_v13 = vld [vmem:[#allocation6 + $0x5b4] ss:$28 sps:$4 sm:$0xff]  }
 0x1b8   :  { %2546 = vmatpush1.bf16.msra.mxu1 %v3468_v14  ;;  %v3536_v14 = vld [vmem:[#allocation6 + $0x5bc] ss:$28 sps:$4 sm:$0xff]  }
 0x1b9   :  { %2556 = vmatprep.subr.bf16.mxu1 %v3476_v15  ;;  %v3531_v15 = vld [vmem:[#allocation6 + $0x5b0] ss:$28 sps:$4 sm:$0xff]  }
 0x1ee   :  { %v891_v17 = vpop.f32.mrb[4].mxu1 }
 0x1ef   :  { %v893_v19 = vpop.f32.mrb[5].mxu1 }
 0x1f0   :  { %v895_v22 = vpop.f32.mrb[6].mxu1  ;;  %v850_v24 = vpop.f32.mrb[4].mxu0 }
 0x1f1   :  { %v896_v25 = vpop.f32.mrb[7].mxu1  ;;  %v851_v26 = vadd.f32 %v850_v24, %v319_v18  ;;  %v852_v27 = vpop.f32.mrb[5].mxu0  ;;  %v3539_v18 = vld [vmem:[#allocation6 + $0x5ec] ss:$28 sps:$4 sm:$0xff]   ;;  %v3545_v24 = vld [vmem:[#allocation6 + $0x624] ss:$28 sps:$4 sm:$0xff]  }
 0x1f2   :  { %v853_v28 = vadd.f32 %v852_v27, %v323_v21  ;;  %v854_v29 = vpop.f32.mrb[6].mxu0  ;;  %v3537_v21 = vld [vmem:[#allocation6 + $0x5e8] ss:$28 sps:$4 sm:$0xff]   ;;  %v3540_v22 = vld [vmem:[#allocation6 + $0x5f0] ss:$28 sps:$4 sm:$0xff]  }
 0x1f3   :  { %v892_v30 = vadd.f32 %v891_v17, %v851_v26  ;;  %v855_v31 = vpop.f32.mrb[7].mxu0  ;;  %v3534_v17 = vld [vmem:[#allocation6 + $0x5b8] ss:$28 sps:$4 sm:$0xff]   ;;  %v3548_v25 = vld [vmem:[#allocation6 + $0x62c] ss:$28 sps:$4 sm:$0xff]  }
 0x1f4   :  { %v894_v32 = vadd.f32 %v893_v19, %v853_v28  ;;  %v3542_v19 = vld [vmem:[#allocation6 + $0x5f4] ss:$28 sps:$4 sm:$0xff]   ;;  %v3543_v26 = vld [vmem:[#allocation6 + $0x620] ss:$28 sps:$4 sm:$0xff]   ;;  %v3546_v27 = vld [vmem:[#allocation6 + $0x628] ss:$28 sps:$4 sm:$0xff]  }
 0x1f5   :  { %v980_v23 = vmax.f32 %v892_v30, 0.0  ;;  %v3551_v28 = vld [vmem:[#allocation6 + $0x65c] ss:$28 sps:$4 sm:$0xff]   ;;  %v3554_v29 = vld [vmem:[#allocation6 + $0x664] ss:$28 sps:$4 sm:$0xff]  }
 0x1f6   :  { %v981_v33 = vmax.f32 %v894_v32, 0.0  ;;  %v3549_v30 = vld [vmem:[#allocation6 + $0x658] ss:$28 sps:$4 sm:$0xff]   ;;  %v3552_v31 = vld [vmem:[#allocation6 + $0x660] ss:$28 sps:$4 sm:$0xff]  }
 0x1f7   :  { %v3909_v36 = vpack.c.bf16 %v980_v23, %v980_v23  ;;  %v3557_v32 = vld [vmem:[#allocation6 + $0x694] ss:$28 sps:$4 sm:$0xff]   ;;  %v3560_v23 = vld [vmem:[#allocation6 + $0x69c] ss:$28 sps:$4 sm:$0xff]  }
 0x1f8   :  { %v3907_v34 = vpack.c.bf16 %v981_v33, %v981_v33  ;;  %v3555_v33 = vld [vmem:[#allocation6 + $0x690] ss:$28 sps:$4 sm:$0xff]  }
 0x1fa   :  { %2465 = vmatprep.mubr.bf16.mxu0 %v3907_v34  ;;  %2547 = vmatprep.mubr.bf16.mxu1 %v3907_v34 }
 0x1fb   :  { %2466 = vmatmul.mubr.bf16.vlgmr.msra.gmra.mrb[8].mxu0 %v3909_v36  ;;  %2548 = vmatmul.mubr.bf16.vlgmr.msra.gmra.mrb[12].mxu1 %v3909_v36 }
 0x1fc   :  { %2475 = vmatpush1.bf16.msra.mxu0 %v3471_v1  ;;  %2557 = vmatpush1.bf16.msra.mxu1 %v3474_v35  ;;  %v3558_v1 = vld [vmem:[#allocation6 + $0x698] ss:$28 sps:$4 sm:$0xff]   ;;  %v3563_v35 = vld [vmem:[#allocation6 + $0x6cc] ss:$28 sps:$4 sm:$0xff]  }
 0x1fd   :  { %2476 = vmatprep.subr.bf16.mxu0 %v3479_v37  ;;  %2558 = vmatprep.subr.bf16.mxu1 %v3482_v38  ;;  %v3566_v37 = vld [vmem:[#allocation6 + $0x6d4] ss:$28 sps:$4 sm:$0xff]   ;;  %v3561_v38 = vld [vmem:[#allocation6 + $0x6c8] ss:$28 sps:$4 sm:$0xff]  }
 0x200   :  { %2477 = vmatpush1.bf16.msra.mxu0 %v3477_v39  ;;  %2559 = vmatpush1.bf16.msra.mxu1 %v3480_v40  ;;  %v3564_v39 = vld [vmem:[#allocation6 + $0x6d0] ss:$28 sps:$4 sm:$0xff]  }
 0x201   :  { %2478 = vmatprep.subr.bf16.mxu0 %v3485_v41  ;;  %2560 = vmatprep.subr.bf16.mxu1 %v3488_v42  ;;  %v3569_v40 = vld [vmem:[#allocation6 + $0x14] ss:$28 sps:$4 sm:$0xff]   ;;  %v330_v42 = vsub.s32 3, %v3872_v61 }
 0x202   :  { %v3570_v41 = vld [vmem:[#allocation6 + $0x1d8] ss:$28 sps:$4 sm:$0xff]  }
 0x204   :  { %2479 = vmatpush1.bf16.msra.mxu0 %v3483_v43  ;;  %2561 = vmatpush1.bf16.msra.mxu1 %v3486_v44  ;;  %v327_v43 = vrot.slane %v3901_v16, %v3875_v62  ;;  %v331_v44 = vrot.slane %v3901_v16, %v330_v42  ;;  %v3575_v16 = vld [vmem:[#allocation6 + $0x210] ss:$28 sps:$4 sm:$0xff]  }
 0x205   :  { %2480 = vmatprep.subr.bf16.mxu0 %v3491_v45  ;;  %2562 = vmatprep.subr.bf16.mxu1 %v3494_v46 }
 0x208   :  { %2481 = vmatpush1.bf16.msra.mxu0 %v3489_v47  ;;  %2563 = vmatpush1.bf16.msra.mxu1 %v3492_v48 }
 0x209   :  { %2482 = vmatprep.subr.bf16.mxu0 %v3497_v49  ;;  %2564 = vmatprep.subr.bf16.mxu1 %v3500_v50 }
 0x20c   :  { %2483 = vmatpush1.bf16.msra.mxu0 %v3495_v51  ;;  %2565 = vmatpush1.bf16.msra.mxu1 %v3498_v52 }
 0x20d   :  { %2484 = vmatprep.subr.bf16.mxu0 %v3503_v53  ;;  %2566 = vmatprep.subr.bf16.mxu1 %v3506_v20  ;;  %v3567_v20 = vld [vmem:[#allocation6 + $0x10] ss:$28 sps:$4 sm:$0xff]  }
 0x210   :  { %2485 = vmatpush1.bf16.msra.mxu0 %v3501_v54  ;;  %2567 = vmatpush1.bf16.msra.mxu1 %v3504_v55  ;;  %v3571_v54 = vld [vmem:[#allocation6 + $0x18] ss:$28 sps:$4 sm:$0xff]  }
 0x211   :  { %2486 = vmatprep.subr.bf16.mxu0 %v3509_v56  ;;  %2568 = vmatprep.subr.bf16.mxu1 %v3512_v57  ;;  %v3574_v56 = vld [vmem:[#allocation6 + $0x4c] ss:$28 sps:$4 sm:$0xff]  }
 0x212   :  { %v3572_v57 = vld [vmem:[#allocation6 + $0x48] ss:$28 sps:$4 sm:$0xff]  }
 0x214   :  { %2487 = vmatpush1.bf16.msra.mxu0 %v3507_v58  ;;  %2569 = vmatpush1.bf16.msra.mxu1 %v3510_v59  ;;  %v3576_v58 = vld [vmem:[#allocation6 + $0x50] ss:$28 sps:$4 sm:$0xff]   ;;  %v3579_v59 = vld [vmem:[#allocation6 + $0x84] ss:$28 sps:$4 sm:$0xff]  }
 0x215   :  { %2488 = vmatprep.subr.bf16.mxu0 %v3515_v60  ;;  %2570 = vmatprep.subr.bf16.mxu1 %v3518_v63  ;;  %v3580_v60 = vld [vmem:[#allocation6 + $0x248] ss:$28 sps:$4 sm:$0xff]   ;;  %v3577_v63 = vld [vmem:[#allocation6 + $0x80] ss:$28 sps:$4 sm:$0xff]  }
 0x218   :  { %2489 = vmatpush1.bf16.msra.mxu0 %v3513_v3  ;;  %2571 = vmatpush1.bf16.msra.mxu1 %v3516_v4  ;;  %v3581_v3 = vld [vmem:[#allocation6 + $0x88] ss:$28 sps:$4 sm:$0xff]   ;;  %v3584_v4 = vld [vmem:[#allocation6 + $0xbc] ss:$28 sps:$4 sm:$0xff]  }
 0x219   :  { %2490 = vmatprep.subr.bf16.mxu0 %v3521_v5  ;;  %2572 = vmatprep.subr.bf16.mxu1 %v3524_v6  ;;  %v3585_v5 = vld [vmem:[#allocation6 + $0x280] ss:$28 sps:$4 sm:$0xff]   ;;  %v3582_v6 = vld [vmem:[#allocation6 + $0xb8] ss:$28 sps:$4 sm:$0xff]  }
 0x21c   :  { %2491 = vmatpush1.bf16.msra.mxu0 %v3519_v7  ;;  %2573 = vmatpush1.bf16.msra.mxu1 %v3522_v8  ;;  %v3586_v7 = vld [vmem:[#allocation6 + $0xc0] ss:$28 sps:$4 sm:$0xff]   ;;  %v3589_v8 = vld [vmem:[#allocation6 + $0xf4] ss:$28 sps:$4 sm:$0xff]  }
 0x21d   :  { %2492 = vmatprep.subr.bf16.mxu0 %v3527_v9  ;;  %2574 = vmatprep.subr.bf16.mxu1 %v3530_v10  ;;  %v3587_v9 = vld [vmem:[#allocation6 + $0xf0] ss:$28 sps:$4 sm:$0xff]   ;;  %v3591_v10 = vld [vmem:[#allocation6 + $0xf8] ss:$28 sps:$4 sm:$0xff]  }
 0x220   :  { %2493 = vmatpush1.bf16.msra.mxu0 %v3525_v11  ;;  %2575 = vmatpush1.bf16.msra.mxu1 %v3528_v12  ;;  %v3594_v11 = vld [vmem:[#allocation6 + $0x12c] ss:$28 sps:$4 sm:$0xff]  }
 0x221   :  { %2494 = vmatprep.subr.bf16.mxu0 %v3533_v13  ;;  %2576 = vmatprep.subr.bf16.mxu1 %v3536_v14  ;;  %v3595_v12 = vld [vmem:[#allocation6 + $0x2f0] ss:$28 sps:$4 sm:$0xff]   ;;  %v3592_v13 = vld [vmem:[#allocation6 + $0x128] ss:$28 sps:$4 sm:$0xff]  }
 0x222   :  { %v3596_v14 = vld [vmem:[#allocation6 + $0x130] ss:$28 sps:$4 sm:$0xff]  }
 0x224   :  { %2495 = vmatpush1.bf16.msra.mxu0 %v3531_v15  ;;  %2577 = vmatpush1.bf16.msra.mxu1 %v3534_v17  ;;  %v3599_v15 = vld [vmem:[#allocation6 + $0x164] ss:$28 sps:$4 sm:$0xff]  }
 0x225   :  { %2496 = vmatprep.subr.bf16.mxu0 %v3539_v18  ;;  %2578 = vmatprep.subr.bf16.mxu1 %v3542_v19  ;;  %v3600_v17 = vld [vmem:[#allocation6 + $0x328] ss:$28 sps:$4 sm:$0xff]   ;;  %v3597_v18 = vld [vmem:[#allocation6 + $0x160] ss:$28 sps:$4 sm:$0xff]  }
 0x226   :  { %v3601_v19 = vld [vmem:[#allocation6 + $0x168] ss:$28 sps:$4 sm:$0xff]  }
 0x228   :  { %2497 = vmatpush1.bf16.msra.mxu0 %v3537_v21  ;;  %2579 = vmatpush1.bf16.msra.mxu1 %v3540_v22  ;;  %v3604_v21 = vld [vmem:[#allocation6 + $0x19c] ss:$28 sps:$4 sm:$0xff]  }
 0x229   :  { %2498 = vmatprep.subr.bf16.mxu0 %v3545_v24  ;;  %2580 = vmatprep.subr.bf16.mxu1 %v3548_v25  ;;  %v3605_v22 = vld [vmem:[#allocation6 + $0x360] ss:$28 sps:$4 sm:$0xff]   ;;  %v3602_v24 = vld [vmem:[#allocation6 + $0x198] ss:$28 sps:$4 sm:$0xff]  }
 0x22a   :  { %v3606_v25 = vld [vmem:[#allocation6 + $0x1a0] ss:$28 sps:$4 sm:$0xff]  }
 0x22c   :  { %2499 = vmatpush1.bf16.msra.mxu0 %v3543_v26  ;;  %2581 = vmatpush1.bf16.msra.mxu1 %v3546_v27  ;;  %v3609_v26 = vld [vmem:[#allocation6 + $0x1d4] ss:$28 sps:$4 sm:$0xff]  }
 0x22d   :  { %2500 = vmatprep.subr.bf16.mxu0 %v3551_v28  ;;  %2582 = vmatprep.subr.bf16.mxu1 %v3554_v29  ;;  %v3610_v27 = vld [vmem:[#allocation6 + $0x558] ss:$28 sps:$4 sm:$0xff]   ;;  %v3607_v28 = vld [vmem:[#allocation6 + $0x1d0] ss:$28 sps:$4 sm:$0xff]  }
 0x22e   :  { %v3611_v29 = vld [vmem:[#allocation6 + $0x398] ss:$28 sps:$4 sm:$0xff]  }
 0x230   :  { %2501 = vmatpush1.bf16.msra.mxu0 %v3549_v30  ;;  %2583 = vmatpush1.bf16.msra.mxu1 %v3552_v31  ;;  %v3614_v30 = vld [vmem:[#allocation6 + $0x20c] ss:$28 sps:$4 sm:$0xff]  }
 0x231   :  { %2502 = vmatprep.subr.bf16.mxu0 %v3557_v32  ;;  %2584 = vmatprep.subr.bf16.mxu1 %v3560_v23  ;;  %v3615_v31 = vld [vmem:[#allocation6 + $0x590] ss:$28 sps:$4 sm:$0xff]   ;;  %v3612_v32 = vld [vmem:[#allocation6 + $0x208] ss:$28 sps:$4 sm:$0xff]  }
 0x232   :  { %v3616_v23 = vld [vmem:[#allocation6 + $0x3d0] ss:$28 sps:$4 sm:$0xff]  }
 0x234   :  { %2503 = vmatpush1.bf16.msra.mxu0 %v3555_v33  ;;  %2585 = vmatpush1.bf16.msra.mxu1 %v3558_v1  ;;  %v3619_v33 = vld [vmem:[#allocation6 + $0x244] ss:$28 sps:$4 sm:$0xff]  }
 0x235   :  { %2504 = vmatprep.subr.bf16.mxu0 %v3563_v35  ;;  %2586 = vmatprep.subr.bf16.mxu1 %v3566_v37  ;;  %v3620_v1 = vld [vmem:[#allocation6 + $0x5c8] ss:$28 sps:$4 sm:$0xff]   ;;  %v3617_v35 = vld [vmem:[#allocation6 + $0x240] ss:$28 sps:$4 sm:$0xff]  }
 0x236   :  { %v3621_v37 = vld [vmem:[#allocation6 + $0x408] ss:$28 sps:$4 sm:$0xff]  }
 0x238   :  { %2505 = vmatpush1.bf16.msra.mxu0 %v3561_v38  ;;  %2587 = vmatpush1.bf16.msra.mxu1 %v3564_v39  ;;  %v3624_v38 = vld [vmem:[#allocation6 + $0x27c] ss:$28 sps:$4 sm:$0xff]  }
 0x239   :  { %2597 = vmatprep.subr.bf16.mxu0 %v3569_v40  ;;  %3131 = vmatprep.subr.bf16.mxu1 %v3570_v41  ;;  %v3625_v39 = vld [vmem:[#allocation6 + $0x600] ss:$28 sps:$4 sm:$0xff]   ;;  %v3622_v40 = vld [vmem:[#allocation6 + $0x278] ss:$28 sps:$4 sm:$0xff]  }
 0x23a   :  { %v3626_v41 = vld [vmem:[#allocation6 + $0x440] ss:$28 sps:$4 sm:$0xff]  }
 0x24e   :  { %v973_v45 = vpop.f32.mrb[8].mxu1 }
 0x24f   :  { %v3187_v46 = vadd.f32 %v973_v45, %v327_v43  ;;  %v975_v47 = vpop.f32.mrb[9].mxu1  ;;  %v3629_v43 = vld [vmem:[#allocation6 + $0x2b4] ss:$28 sps:$4 sm:$0xff]  }
 0x250   :  { %v3188_v48 = vadd.f32 %v975_v47, %v331_v44  ;;  %v977_v49 = vpop.f32.mrb[10].mxu1  ;;  %v3630_v44 = vld [vmem:[#allocation6 + $0x638] ss:$28 sps:$4 sm:$0xff]   ;;  %v3627_v45 = vld [vmem:[#allocation6 + $0x2b0] ss:$28 sps:$4 sm:$0xff]  }
 0x251   :  { %v982_v50 = vmax.f32 %v3187_v46, 0.0  ;;  %v978_v51 = vpop.f32.mrb[11].mxu1  ;;  %v3631_v46 = vld [vmem:[#allocation6 + $0x478] ss:$28 sps:$4 sm:$0xff]   ;;  %v3634_v47 = vld [vmem:[#allocation6 + $0x2ec] ss:$28 sps:$4 sm:$0xff]  }
 0x252   :  { %v983_v52 = vmax.f32 %v3188_v48, 0.0  ;;  %v3635_v48 = vld [vmem:[#allocation6 + $0x670] ss:$28 sps:$4 sm:$0xff]   ;;  %v3632_v49 = vld [vmem:[#allocation6 + $0x2e8] ss:$28 sps:$4 sm:$0xff]  }
 0x253   :  { %v3923_v55 = vpack.c.bf16 %v982_v50, %v982_v50  ;;  %v3636_v50 = vld [vmem:[#allocation6 + $0x4b0] ss:$28 sps:$4 sm:$0xff]   ;;  %v3639_v51 = vld [vmem:[#allocation6 + $0x324] ss:$28 sps:$4 sm:$0xff]  }
 0x254   :  { %v3921_v53 = vpack.c.bf16 %v983_v52, %v983_v52  ;;  %v3640_v52 = vld [vmem:[#allocation6 + $0x6a8] ss:$28 sps:$4 sm:$0xff]  }
 0x256   :  { %2506 = vmatprep.mubr.bf16.mxu0 %v3921_v53  ;;  %2588 = vmatprep.mubr.bf16.mxu1 %v3921_v53 }
 0x257   :  { %2507 = vmatmul.mubr.bf16.vlgmr.msra.gmra.mrb[8].mxu0 %v3923_v55  ;;  %2589 = vmatmul.mubr.bf16.vlgmr.msra.gmra.mrb[12].mxu1 %v3923_v55 }
 0x258   :  { %2598 = vmatpush1.bf16.msra.mxu0 %v3567_v20  ;;  %3132 = vmatpush3.bf16.msra.mxu1 %v3571_v54  ;;  %v3637_v20 = vld [vmem:[#allocation6 + $0x320] ss:$28 sps:$4 sm:$0xff]   ;;  %v3641_v54 = vld [vmem:[#allocation6 + $0x4e8] ss:$28 sps:$4 sm:$0xff]  }
 0x259   :  { %2629 = vmatprep.mubr.bf16.mxu0 %v3907_v34  ;;  %2711 = vmatprep.mubr.bf16.mxu1 %v3907_v34  ;;  %v3590_v34 = vld [vmem:[#allocation6 + $0x2b8] ss:$28 sps:$4 sm:$0xff]  }
 0x25a   :  { %2599 = vmatprep.subr.bf16.mxu0 %v3574_v56  ;;  %3133 = vmatprep.subr.bf16.mxu1 %v3575_v16  ;;  %v3644_v56 = vld [vmem:[#allocation6 + $0x35c] ss:$28 sps:$4 sm:$0xff]  }
 0x25b   :  { %v3645_v16 = vld [vmem:[#allocation6 + $0x6e0] ss:$28 sps:$4 sm:$0xff]  }
 0x25c   :  { %2600 = vmatpush1.bf16.msra.mxu0 %v3572_v57  ;;  %3134 = vmatpush3.bf16.msra.mxu1 %v3576_v58  ;;  %v3642_v57 = vld [vmem:[#allocation6 + $0x358] ss:$28 sps:$4 sm:$0xff]   ;;  %v3646_v58 = vld [vmem:[#allocation6 + $0x520] ss:$28 sps:$4 sm:$0xff]  }
 0x25d   :  { %2601 = vmatprep.subr.bf16.mxu0 %v3579_v59  ;;  %3135 = vmatprep.subr.bf16.mxu1 %v3580_v60  ;;  %v3649_v59 = vld [vmem:[#allocation6 + $0x394] ss:$28 sps:$4 sm:$0xff]  }
 0x25e   :  { %v3647_v60 = vld [vmem:[#allocation6 + $0x390] ss:$28 sps:$4 sm:$0xff]  }
 0x260   :  { %2602 = vmatpush1.bf16.msra.mxu0 %v3577_v63  ;;  %3136 = vmatpush3.bf16.msra.mxu1 %v3581_v3  ;;  %v3652_v63 = vld [vmem:[#allocation6 + $0x3cc] ss:$28 sps:$4 sm:$0xff]  }
 0x261   :  { %2603 = vmatprep.subr.bf16.mxu0 %v3584_v4  ;;  %3137 = vmatprep.subr.bf16.mxu1 %v3585_v5  ;;  %v3650_v3 = vld [vmem:[#allocation6 + $0x3c8] ss:$28 sps:$4 sm:$0xff]   ;;  %v3653_v5 = vld [vmem:[#allocation6 + $0x400] ss:$28 sps:$4 sm:$0xff]  }
 0x262   :  { %v3655_v4 = vld [vmem:[#allocation6 + $0x404] ss:$28 sps:$4 sm:$0xff]  }
 0x264   :  { %2604 = vmatpush1.bf16.msra.mxu0 %v3582_v6  ;;  %3138 = vmatpush3.bf16.msra.mxu1 %v3586_v7  ;;  %v3658_v6 = vld [vmem:[#allocation6 + $0x43c] ss:$28 sps:$4 sm:$0xff]  }
 0x265   :  { %2605 = vmatprep.subr.bf16.mxu0 %v3589_v8  ;;  %3139 = vmatprep.subr.bf16.mxu1 %v3590_v34  ;;  %v3656_v7 = vld [vmem:[#allocation6 + $0x438] ss:$28 sps:$4 sm:$0xff]   ;;  %v3659_v34 = vld [vmem:[#allocation6 + $0x470] ss:$28 sps:$4 sm:$0xff]  }
 0x266   :  { %v3661_v8 = vld [vmem:[#allocation6 + $0x474] ss:$28 sps:$4 sm:$0xff]  }
 0x268   :  { %2606 = vmatpush1.bf16.msra.mxu0 %v3587_v9  ;;  %3140 = vmatpush3.bf16.msra.mxu1 %v3591_v10  ;;  %v3662_v9 = vld [vmem:[#allocation6 + $0x4a8] ss:$28 sps:$4 sm:$0xff]  }
 0x269   :  { %2607 = vmatprep.subr.bf16.mxu0 %v3594_v11  ;;  %3141 = vmatprep.subr.bf16.mxu1 %v3595_v12  ;;  %v3667_v10 = vld [vmem:[#allocation6 + $0x4e4] ss:$28 sps:$4 sm:$0xff]   ;;  %v3670_v11 = vld [vmem:[#allocation6 + $0x51c] ss:$28 sps:$4 sm:$0xff]  }
 0x26a   :  { %v3668_v12 = vld [vmem:[#allocation6 + $0x518] ss:$28 sps:$4 sm:$0xff]  }
 0x26c   :  { %2608 = vmatpush1.bf16.msra.mxu0 %v3592_v13  ;;  %3142 = vmatpush3.bf16.msra.mxu1 %v3596_v14  ;;  %v3673_v13 = vld [vmem:[#allocation6 + $0x554] ss:$28 sps:$4 sm:$0xff]  }
 0x26d   :  { %2609 = vmatprep.subr.bf16.mxu0 %v3599_v15  ;;  %3143 = vmatprep.subr.bf16.mxu1 %v3600_v17  ;;  %v3671_v14 = vld [vmem:[#allocation6 + $0x550] ss:$28 sps:$4 sm:$0xff]   ;;  %v3674_v17 = vld [vmem:[#allocation6 + $0x588] ss:$28 sps:$4 sm:$0xff]  }
 0x26e   :  { %v3676_v15 = vld [vmem:[#allocation6 + $0x58c] ss:$28 sps:$4 sm:$0xff]  }
 0x270   :  { %2610 = vmatpush1.bf16.msra.mxu0 %v3597_v18  ;;  %3144 = vmatpush3.bf16.msra.mxu1 %v3601_v19  ;;  %v3679_v18 = vld [vmem:[#allocation6 + $0x5c4] ss:$28 sps:$4 sm:$0xff]  }
 0x271   :  { %2611 = vmatprep.subr.bf16.mxu0 %v3604_v21  ;;  %3145 = vmatprep.subr.bf16.mxu1 %v3605_v22  ;;  %v3677_v19 = vld [vmem:[#allocation6 + $0x5c0] ss:$28 sps:$4 sm:$0xff]   ;;  %v3680_v22 = vld [vmem:[#allocation6 + $0x5f8] ss:$28 sps:$4 sm:$0xff]  }
 0x272   :  { %v3682_v21 = vld [vmem:[#allocation6 + $0x5fc] ss:$28 sps:$4 sm:$0xff]  }
 0x274   :  { %2612 = vmatpush1.bf16.msra.mxu0 %v3602_v24  ;;  %3146 = vmatpush3.bf16.msra.mxu1 %v3606_v25  ;;  %v3685_v24 = vld [vmem:[#allocation6 + $0x634] ss:$28 sps:$4 sm:$0xff]  }
 0x275   :  { %2613 = vmatprep.subr.bf16.mxu0 %v3609_v26  ;;  %3153 = vmatprep.subr.bf16.mxu1 %v3610_v27  ;;  %v3683_v25 = vld [vmem:[#allocation6 + $0x630] ss:$28 sps:$4 sm:$0xff]   ;;  %v3686_v27 = vld [vmem:[#allocation6 + $0x668] ss:$28 sps:$4 sm:$0xff]  }
 0x276   :  { %v3688_v26 = vld [vmem:[#allocation6 + $0x66c] ss:$28 sps:$4 sm:$0xff]  }
 0x277   :  { %2712 = vmatmul.mubr.bf16.vlgmr.msra.gmra.mrb[16].mxu1 %v3909_v36 }
 0x278   :  { %2614 = vmatpush1.bf16.msra.mxu0 %v3607_v28  ;;  %3154 = vmatpush3.bf16.msra.mxu1 %v3611_v29  ;;  %v3691_v28 = vld [vmem:[#allocation6 + $0x6a4] ss:$28 sps:$4 sm:$0xff]  }
 0x279   :  { %2751 = vmatprep.mubr.bf16.mxu1 %v3921_v53  ;;  %2615 = vmatprep.subr.bf16.mxu0 %v3614_v30  ;;  %v3689_v29 = vld [vmem:[#allocation6 + $0x6a0] ss:$28 sps:$4 sm:$0xff]  }
 0x27a   :  { %3155 = vmatprep.subr.bf16.mxu1 %v3615_v31  ;;  %v3694_v30 = vld [vmem:[#allocation6 + $0x6dc] ss:$28 sps:$4 sm:$0xff]  }
 0x27b   :  { %v3692_v31 = vld [vmem:[#allocation6 + $0x6d8] ss:$28 sps:$4 sm:$0xff]  }
 0x27c   :  { %2616 = vmatpush1.bf16.msra.mxu0 %v3612_v32  ;;  %3156 = vmatpush3.bf16.msra.mxu1 %v3616_v23  ;;  %v3940_v32 = vld [vmem:[%s3984_s6] sm:$0xff] }
 0x27d   :  { %2617 = vmatprep.subr.bf16.mxu0 %v3619_v33  ;;  %3157 = vmatprep.subr.bf16.mxu1 %v3620_v1  ;;  %v1249_v23 = vrot.slane %v3940_v32, %v3881_v0  ;;  %v1257_v33 = vrot.slane %v3940_v32, %v3875_v62  ;;  %v1253_v1 = vrot.slane %v3940_v32, %v3884_v2 }
 0x280   :  { %2618 = vmatpush1.bf16.msra.mxu0 %v3617_v35  ;;  %3158 = vmatpush3.bf16.msra.mxu1 %v3621_v37  ;;  %v1261_v35 = vrot.slane %v3940_v32, %v330_v42 }
 0x281   :  { %2619 = vmatprep.subr.bf16.mxu0 %v3624_v38  ;;  %3159 = vmatprep.subr.bf16.mxu1 %v3625_v39 }
 0x284   :  { %2620 = vmatpush1.bf16.msra.mxu0 %v3622_v40  ;;  %3160 = vmatpush3.bf16.msra.mxu1 %v3626_v41 }
 0x285   :  { %2621 = vmatprep.subr.bf16.mxu0 %v3629_v43  ;;  %3161 = vmatprep.subr.bf16.mxu1 %v3630_v44 }
 0x288   :  { %2622 = vmatpush1.bf16.msra.mxu0 %v3627_v45  ;;  %3162 = vmatpush3.bf16.msra.mxu1 %v3631_v46 }
 0x289   :  { %2623 = vmatprep.subr.bf16.mxu0 %v3634_v47  ;;  %3163 = vmatprep.subr.bf16.mxu1 %v3635_v48 }
 0x28c   :  { %2624 = vmatpush1.bf16.msra.mxu0 %v3632_v49  ;;  %3164 = vmatpush3.bf16.msra.mxu1 %v3636_v50 }
 0x28d   :  { %2625 = vmatprep.subr.bf16.mxu0 %v3639_v51  ;;  %3165 = vmatprep.subr.bf16.mxu1 %v3640_v52 }
 0x290   :  { %2626 = vmatpush1.bf16.msra.mxu0 %v3637_v20  ;;  %3166 = vmatpush3.bf16.msra.mxu1 %v3641_v54 }
 0x291   :  { %2627 = vmatprep.subr.bf16.mxu0 %v3644_v56  ;;  %3167 = vmatprep.subr.bf16.mxu1 %v3645_v16 }
 0x294   :  { %2628 = vmatpush1.bf16.msra.mxu0 %v3642_v57  ;;  %3168 = vmatpush3.bf16.msra.mxu1 %v3646_v58 }
 0x295   :  { %2638 = vmatprep.subr.bf16.mxu0 %v3649_v59 }
 0x297   :  { %2630 = vmatmul.mubr.bf16.vlgmr.msra.gmra.mrb[12].mxu0 %v3909_v36  ;;  %2752 = vmatmul.mubr.bf16.vlgmr.msra.gmra.mrb[20].mxu1 %v3923_v55  ;;  %v3664_v36 = vld [vmem:[#allocation6 + $0x4ac] ss:$28 sps:$4 sm:$0xff]  }
 0x298   :  { %2639 = vmatpush1.bf16.msra.mxu0 %v3647_v60  ;;  %2670 = vmatprep.mubr.bf16.mxu0 %v3921_v53  ;;  %v3665_v53 = vld [vmem:[#allocation6 + $0x4e0] ss:$28 sps:$4 sm:$0xff]  }
 0x299   :  { %2640 = vmatprep.subr.bf16.mxu0 %v3652_v63 }
 0x29c   :  { %2641 = vmatpush1.bf16.msra.mxu0 %v3650_v3 }
 0x29d   :  { %2642 = vmatprep.subr.bf16.mxu0 %v3655_v4 }
 0x2a0   :  { %2643 = vmatpush1.bf16.msra.mxu0 %v3653_v5 }
 0x2a1   :  { %2644 = vmatprep.subr.bf16.mxu0 %v3658_v6 }
 0x2a4   :  { %2645 = vmatpush1.bf16.msra.mxu0 %v3656_v7  ;;  %v1272_v7 = vsub.s32 6, %v3872_v61 }
 0x2a5   :  { %2646 = vmatprep.subr.bf16.mxu0 %v3661_v8 }
 0x2a6   :  { %v1273_v8 = vrot.slane %v3940_v32, %v1272_v7 }
 0x2a8   :  { %2647 = vmatpush1.bf16.msra.mxu0 %v3659_v34 }
 0x2a9   :  { %2648 = vmatprep.subr.bf16.mxu0 %v3664_v36 }
 0x2ac   :  { %2649 = vmatpush1.bf16.msra.mxu0 %v3662_v9 }
 0x2ad   :  { %2650 = vmatprep.subr.bf16.mxu0 %v3667_v10 }
 0x2b0   :  { %2651 = vmatpush1.bf16.msra.mxu0 %v3665_v53 }
 0x2b1   :  { %2652 = vmatprep.subr.bf16.mxu0 %v3670_v11 }
 0x2b4   :  { %2653 = vmatpush1.bf16.msra.mxu0 %v3668_v12 }
 0x2b5   :  { %2654 = vmatprep.subr.bf16.mxu0 %v3673_v13 }
 0x2b8   :  { %2655 = vmatpush1.bf16.msra.mxu0 %v3671_v14 }
 0x2b9   :  { %2656 = vmatprep.subr.bf16.mxu0 %v3676_v15 }
 0x2bc   :  { %2657 = vmatpush1.bf16.msra.mxu0 %v3674_v17 }
 0x2bd   :  { %2658 = vmatprep.subr.bf16.mxu0 %v3679_v18  ;;  %v1264_v18 = vsub.s32 4, %v3872_v61 }
 0x2c0   :  { %2659 = vmatpush1.bf16.msra.mxu0 %v3677_v19  ;;  %v1268_v19 = vsub.s32 5, %v3872_v61 }
 0x2c1   :  { %2660 = vmatprep.subr.bf16.mxu0 %v3682_v21  ;;  %v1265_v21 = vrot.slane %v3940_v32, %v1264_v18 }
 0x2c4   :  { %2661 = vmatpush1.bf16.msra.mxu0 %v3680_v22  ;;  %v1269_v22 = vrot.slane %v3940_v32, %v1268_v19 }
 0x2c5   :  { %2662 = vmatprep.subr.bf16.mxu0 %v3685_v24 }
 0x2c8   :  { %2663 = vmatpush1.bf16.msra.mxu0 %v3683_v25 }
 0x2c9   :  { %2664 = vmatprep.subr.bf16.mxu0 %v3688_v26 }
 0x2cc   :  { %2665 = vmatpush1.bf16.msra.mxu0 %v3686_v27 }
 0x2cd   :  { %2666 = vmatprep.subr.bf16.mxu0 %v3691_v28 }
 0x2d0   :  { %2667 = vmatpush1.bf16.msra.mxu0 %v3689_v29 }
 0x2d1   :  { %2668 = vmatprep.subr.bf16.mxu0 %v3694_v30 }
 0x2d4   :  { %2669 = vmatpush1.bf16.msra.mxu0 %v3692_v31 }
 0x2d7   :  { %2671 = vmatmul.mubr.bf16.vlgmr.msra.gmra.mrb[12].mxu0 %v3923_v55 }
 0x32a   :  { %v2508_v37 = vpop.f32.mrb[8].mxu0  ;;  %v2590_v55 = vpop.f32.mrb[12].mxu1 }
 0x32b   :  { %v3189_v38 = vadd.f32 %v2508_v37, %v1249_v23  ;;  %v3191_v39 = vadd.f32 %v2590_v55, %v1257_v33  ;;  %v2510_v40 = vpop.f32.mrb[9].mxu0  ;;  %v2592_v41 = vpop.f32.mrb[13].mxu1 }
 0x32c   :  { %v3190_v43 = vadd.f32 %v2510_v40, %v1253_v1  ;;  %v3192_v44 = vadd.f32 %v2592_v41, %v1261_v35  ;;  %v2512_v45 = vpop.f32.mrb[10].mxu0  ;;  %v2594_v0 = vpop.f32.mrb[14].mxu1 }
 0x32d   :  { %v2759_v46 = vmul.f32 0.5, %v3189_v38  ;;  %v2761_v47 = vmul.f32 0.5, %v3191_v39  ;;  %v2513_v62 = vpop.f32.mrb[11].mxu0  ;;  %v2595_v48 = vpop.f32.mrb[15].mxu1 }
 0x32e   :  { %v2760_v49 = vmul.f32 0.5, %v3190_v43  ;;  %v2762_v2 = vmul.f32 0.5, %v3192_v44 }
 0x32f   :  { %3695 = vtanh.f32 %v2759_v46 }
 0x330   :  { %3697 = vtanh.f32 %v2761_v47 }
 0x331   :  { %3699 = vtanh.f32 %v2760_v49 }
 0x332   :  { %3701 = vtanh.f32 %v2762_v2 }
 0x339   :  { %v3696_v42 = vpop.eup %3695 }
 0x33a   :  { %v3698_v50 = vpop.eup %3697  ;;  %v2773_v51 = vmul.f32 0.5, %v3696_v42 }
 0x33b   :  { %v3700_v52 = vpop.eup %3699  ;;  %v2775_v20 = vmul.f32 0.5, %v3698_v50 }
 0x33c   :  { %v3702_v54 = vpop.eup %3701  ;;  %v2780_v56 = vadd.f32 0.5, %v2773_v51  ;;  %v2774_v16 = vmul.f32 0.5, %v3700_v52 }
 0x33d   :  { %v2782_v57 = vadd.f32 0.5, %v2775_v20  ;;  %v2776_v58 = vmul.f32 0.5, %v3702_v54 }
 0x33e   :  { %2787 = vst [vmem:[%s3985_s7] sm:$0xff] %v2780_v56  ;;  %v2781_v59 = vadd.f32 0.5, %v2774_v16 }
 0x33f   :  { %2789 = vst [vmem:[%s3985_s7 + $0x10] sm:$0xff] %v2782_v57  ;;  %v2783_v60 = vadd.f32 0.5, %v2776_v58 }
 0x340   :  { %2788 = vst [vmem:[%s3985_s7 + $0x8] sm:$0xff] %v2781_v59 }
 0x341   :  { %2790 = vst [vmem:[%s3985_s7 + $0x18] sm:$0xff] %v2783_v60 }
 0x34a   :  { %v3147_v63 = vpop.f32.mrb[16].mxu1 }
 0x34b   :  { %v3148_v3 = vpop.f32.mrb[17].mxu1 }
 0x34c   :  { %v3149_v4 = vadd.f32 %v3148_v3, %v3147_v63  ;;  %v3150_v5 = vpop.f32.mrb[18].mxu1 }
 0x34d   :  { %v3151_v6 = vpop.f32.mrb[19].mxu1 }
 0x34e   :  { %v2714_v9 = vadd.f32 %v3149_v4, %v1273_v8 }
 0x36a   :  { %v3169_v34 = vpop.f32.mrb[20].mxu1 }
 0x36b   :  { %v3170_v36 = vpop.f32.mrb[21].mxu1 }
 0x36c   :  { %v3171_v10 = vadd.f32 %v3170_v36, %v3169_v34  ;;  %v3172_v53 = vpop.f32.mrb[22].mxu1 }
 0x36d   :  { %v3173_v11 = vpop.f32.mrb[23].mxu1 }
 0x36e   :  { %v2754_v12 = vadd.f32 %v3171_v10, %v2714_v9 }
 0x370   :  { %v2765_v13 = vmul.f32 0.5, %v2754_v12 }
 0x372   :  { %3703 = vtanh.f32 %v2765_v13 }
 0x37c   :  { %v3704_v14 = vpop.eup %3703 }
 0x37d   :  { %v2779_v15 = vmul.f32 0.5, %v3704_v14 }
 0x37f   :  { %v2786_v17 = vadd.f32 0.5, %v2779_v15 }
 0x381   :  { %2793 = vst [vmem:[%s3985_s7 + $0x30] sm:$0xff] %v2786_v17 }
 0x3aa   :  { %v2672_v24 = vpop.f32.mrb[12].mxu0 }
 0x3ab   :  { %v3193_v25 = vadd.f32 %v2672_v24, %v1265_v21  ;;  %v2674_v26 = vpop.f32.mrb[13].mxu0 }
 0x3ac   :  { %v3194_v27 = vadd.f32 %v2674_v26, %v1269_v22  ;;  %v2676_v28 = vpop.f32.mrb[14].mxu0 }
 0x3ad   :  { %v2763_v29 = vmul.f32 0.5, %v3193_v25  ;;  %v2677_v30 = vpop.f32.mrb[15].mxu0 }
 0x3ae   :  { %v2764_v31 = vmul.f32 0.5, %v3194_v27 }
 0x3af   :  { %3705 = vtanh.f32 %v2763_v29 }
 0x3b0   :  { %3707 = vtanh.f32 %v2764_v31 }
 0x3b9   :  { %v3706_v23 = vpop.eup %3705 }
 0x3ba   :  { %v3708_v33 = vpop.eup %3707  ;;  %v2777_v1 = vmul.f32 0.5, %v3706_v23 }
 0x3bb   :  { %v2778_v35 = vmul.f32 0.5, %v3708_v33 }
 0x3bc   :  { %v2784_v37 = vadd.f32 0.5, %v2777_v1 }
 0x3bd   :  { %v2785_v61 = vadd.f32 0.5, %v2778_v35 }
 0x3be   :  { %2791 = vst [vmem:[%s3985_s7 + $0x20] sm:$0xff] %v2784_v37 }
 0x3bf   :  { %2792 = vst [vmem:[%s3985_s7 + $0x28] sm:$0xff] %v2785_v61 }
 0x3c0   :  { %2798 = vsyncpa [#allocation3], 1 }
 0x3c1   :  { %2799 = vsyncpa [#allocation5], 1 }

</bundles_post_ra>
